<compile_context>
chip_gen: v6e
topology: v6e:2x2x1
jax: 0.10.0
libtpu: 0.0.40
codegen_flags: <defaults>
</compile_context>

<pallas_src>
import functools

import jax
import jax.numpy as jnp
from jax.experimental import pallas as pl
from jax.experimental.pallas import tpu as pltpu


def unfold_kernel(x_ref, o_ref, *, C, k, numW, T):
    # x_ref block: (1, C, T, k, Wc)        with Wc = numW*k (lane-dense input)
    # o_ref block: (1, T, numW, C*k*k)     (lane-dense output)
    #
    # out[t, pw, c*k*k + kh*k + kw] = x[c, t, kh, pw*k + kw]
    parts = []
    for c in range(C):
        for kh in range(k):
            row = x_ref[0, c, :, kh, :]              # (T, Wc) — dense lane load
            parts.append(row.reshape(T, numW, k))    # split lanes (pw, kw) on-chip
    # Concatenate along lanes in (c, kh) order: part index m = c*k + kh lands at
    # columns [m*k, m*k + k) = [c*k*k + kh*k, ... + k)  ->  matches torch layout.
    y = jnp.concatenate(parts, axis=-1)              # (T, numW, C*k*k)
    o_ref[0, :, :, :] = y                            # single dense store


def _round_up(v, m):
    return -(-v // m) * m


def _pick_ph_tile(N, C, numH, numW, k, itemsize, budget_bytes=16 << 20):
    """Largest divisor T of numH whose double-buffered, padded in+out blocks fit
    the budget while keeping >= 2 parallel grid steps when possible."""
    Wc = numW * k
    in_row = C * _round_up(k, 8) * _round_up(Wc, 128) * itemsize
    out_row = _round_up(numW, 8) * _round_up(C * k * k, 128) * itemsize
    per_row = 2 * (in_row + out_row)                 # x2: double buffering
    best = 1
    for t in range(1, numH + 1):
        if numH % t:
            continue
        if t * per_row > budget_bytes:
            break
        if t > 1 and N * (numH // t) < 2:
            break                                    # keep megacore fed
        best = t
    return best


def unfold(x, kernel_size):
    """Pallas equivalent of `_unfold_(kernel_size)(x)` for x of shape (N, C, H, W)."""
    k = int(kernel_size)
    N, C, H, W = x.shape
    numH, numW = H // k, W // k
    kk = k * k
    out_feat = C * kk

    if numH == 0 or numW == 0:                       # degenerate: no full patch
        return jnp.zeros((N, numH * numW, out_feat), x.dtype)

    if numH * k != H or numW * k != W:               # crop exactly like torch
        # TODO(synk): fold this crop into the BlockSpec index_map to avoid the
        # extra HBM pass on the ragged path.
        x = x[:, :, :numH * k, :numW * k]

    Wc = numW * k
    itemsize = x.dtype.itemsize

    # Free, contiguous re-bracketing: x5[n, c, ph, kh, w] = x[n, c, ph*k + kh, w]
    x5 = x.reshape(N, C, numH, k, Wc)

    T = _pick_ph_tile(N, C, numH, numW, k, itemsize)

    kernel = functools.partial(unfold_kernel, C=C, k=k, numW=numW, T=T)

    out4 = pl.pallas_call(
        kernel,
        out_shape=jax.ShapeDtypeStruct((N, numH, numW, out_feat), x.dtype),
        grid_spec=pltpu.PrefetchScalarGridSpec(
            num_scalar_prefetch=0,
            grid=(N, numH // T),
            in_specs=[
                # Lane-dense input block: minor two dims (k, Wc) == full dims.
                pl.BlockSpec((1, C, T, k, Wc),
                             lambda n, ph: (n, 0, ph, 0, 0)),
            ],
            # Lane-dense output block: minor two dims (numW, C*k*k) == full dims.
            out_specs=pl.BlockSpec((1, T, numW, out_feat),
                                   lambda n, ph: (n, ph, 0, 0)),
        ),
        compiler_params=pltpu.CompilerParams(
            dimension_semantics=("parallel", "parallel"),
            vmem_limit_bytes=32 * 1024 * 1024),
        cost_estimate=pl.CostEstimate(
            flops=0, transcendentals=0,
            bytes_accessed=2 * N * C * numH * k * Wc * itemsize),
    )(x5)

    # Free contiguous reshape: (N, numH, numW, C*k*k) -> (N, numH*numW, C*k*k)
    return out4.reshape(N, numH * numW, out_feat)


def unfold_ref(x, kernel_size):
    """Pure-JAX mirror of the PyTorch forward (reshape/permute chain)."""
    k = int(kernel_size)
    N, C, H, W = x.shape
    numH, numW = H // k, W // k
    x = x[:, :, :numH * k, :numW * k]
    Wc = numW * k
    y = x.reshape(N, C, numH, k, Wc)
    y = y.transpose(0, 1, 2, 4, 3)                   # (N, C, numH, Wc, k)
    y = y.reshape(N * C, numH, numW, k, k)
    y = y.transpose(0, 1, 2, 4, 3)                   # swap last two
    y = y.reshape(N, C, numH * numW, k * k)
    y = y.transpose(0, 2, 1, 3)                      # (N, P, C, k*k)
    return y.reshape(N, numH * numW, C * k * k)


if __name__ == "__main__":
    key = jax.random.PRNGKey(0)
    key1, key2, key3 = jax.random.split(key, 3)

    # Case 1: spatial dims divisible by the kernel size.
    x1 = jax.random.normal(key1, (2, 4, 16, 16), dtype=jnp.float32)
    out1 = jax.block_until_ready(unfold(x1, 4))
    ref1 = unfold_ref(x1, 4)
    assert out1.shape == (2, 16, 4 * 4 * 4)
    assert bool(jnp.array_equal(out1, ref1))

    # Case 2: non-divisible spatial dims (exercises the crop path).
    x2 = jax.random.normal(key2, (2, 4, 18, 19), dtype=jnp.float32)
    out2 = jax.block_until_ready(unfold(x2, 4))
    ref2 = unfold_ref(x2, 4)
    assert out2.shape == (2, 16, 4 * 4 * 4)
    assert bool(jnp.array_equal(out2, ref2))

    # Case 3: slightly larger so the output row is >= 128 lanes / 8 sublanes
    # (exercises the fully dense store / writeback path).
    x3 = jax.random.normal(key3, (2, 8, 32, 32), dtype=jnp.float32)
    out3 = jax.block_until_ready(unfold(x3, 4))
    ref3 = unfold_ref(x3, 4)
    assert out3.shape == (2, 64, 8 * 4 * 4)
    assert bool(jnp.array_equal(out3, ref3))

    print("KERNEL_OK")
</pallas_src>

<mosaic_0001>
module attributes {stable_mosaic.version = 11 : i64} {
  func.func @unfold_kernel(%arg0: i32, %arg1: i32, %arg2: memref<1x4x4x4x16xf32, #tpu.memory_space<vmem>>, %arg3: memref<1x4x4x64xf32, #tpu.memory_space<vmem>>) attributes {dimension_semantics = [#tpu.dimension_semantics<parallel>, #tpu.dimension_semantics<parallel>], iteration_bounds = array<i64: 2, 1>, scalar_prefetch = 0 : i64, scratch_operands = 0 : i64, tpu.core_type = #tpu.core_type<tc>, window_params = [{transform_indices = @transform_0, window_bounds = array<i64: 1, 4, 4, 4, 16>}, {transform_indices = @transform_1, window_bounds = array<i64: 1, 4, 4, 64>}]} {
    %c0 = arith.constant 0 : index
    %c0_0 = arith.constant 0 : index
    %c0_1 = arith.constant 0 : index
    %c0_2 = arith.constant 0 : index
    %c0_3 = arith.constant 0 : index
    %0 = vector.load %arg2[%c0, %c0_0, %c0_1, %c0_2, %c0_3] : memref<1x4x4x4x16xf32, #tpu.memory_space<vmem>>, vector<1x1x4x1x16xf32>
    %1 = vector.shape_cast %0 : vector<1x1x4x1x16xf32> to vector<4x16xf32>
    %2 = vector.shape_cast %1 : vector<4x16xf32> to vector<4x4x4xf32>
    %c0_4 = arith.constant 0 : index
    %c0_5 = arith.constant 0 : index
    %c0_6 = arith.constant 0 : index
    %c1 = arith.constant 1 : index
    %c0_7 = arith.constant 0 : index
    %3 = vector.load %arg2[%c0_4, %c0_5, %c0_6, %c1, %c0_7] : memref<1x4x4x4x16xf32, #tpu.memory_space<vmem>>, vector<1x1x4x1x16xf32>
    %4 = vector.shape_cast %3 : vector<1x1x4x1x16xf32> to vector<4x16xf32>
    %5 = vector.shape_cast %4 : vector<4x16xf32> to vector<4x4x4xf32>
    %c0_8 = arith.constant 0 : index
    %c0_9 = arith.constant 0 : index
    %c0_10 = arith.constant 0 : index
    %c2 = arith.constant 2 : index
    %c0_11 = arith.constant 0 : index
    %6 = vector.load %arg2[%c0_8, %c0_9, %c0_10, %c2, %c0_11] : memref<1x4x4x4x16xf32, #tpu.memory_space<vmem>>, vector<1x1x4x1x16xf32>
    %7 = vector.shape_cast %6 : vector<1x1x4x1x16xf32> to vector<4x16xf32>
    %8 = vector.shape_cast %7 : vector<4x16xf32> to vector<4x4x4xf32>
    %c0_12 = arith.constant 0 : index
    %c0_13 = arith.constant 0 : index
    %c0_14 = arith.constant 0 : index
    %c3 = arith.constant 3 : index
    %c0_15 = arith.constant 0 : index
    %9 = vector.load %arg2[%c0_12, %c0_13, %c0_14, %c3, %c0_15] : memref<1x4x4x4x16xf32, #tpu.memory_space<vmem>>, vector<1x1x4x1x16xf32>
    %10 = vector.shape_cast %9 : vector<1x1x4x1x16xf32> to vector<4x16xf32>
    %11 = vector.shape_cast %10 : vector<4x16xf32> to vector<4x4x4xf32>
    %c0_16 = arith.constant 0 : index
    %c1_17 = arith.constant 1 : index
    %c0_18 = arith.constant 0 : index
    %c0_19 = arith.constant 0 : index
    %c0_20 = arith.constant 0 : index
    %12 = vector.load %arg2[%c0_16, %c1_17, %c0_18, %c0_19, %c0_20] : memref<1x4x4x4x16xf32, #tpu.memory_space<vmem>>, vector<1x1x4x1x16xf32>
    %13 = vector.shape_cast %12 : vector<1x1x4x1x16xf32> to vector<4x16xf32>
    %14 = vector.shape_cast %13 : vector<4x16xf32> to vector<4x4x4xf32>
    %c0_21 = arith.constant 0 : index
    %c1_22 = arith.constant 1 : index
    %c0_23 = arith.constant 0 : index
    %c1_24 = arith.constant 1 : index
    %c0_25 = arith.constant 0 : index
    %15 = vector.load %arg2[%c0_21, %c1_22, %c0_23, %c1_24, %c0_25] : memref<1x4x4x4x16xf32, #tpu.memory_space<vmem>>, vector<1x1x4x1x16xf32>
    %16 = vector.shape_cast %15 : vector<1x1x4x1x16xf32> to vector<4x16xf32>
    %17 = vector.shape_cast %16 : vector<4x16xf32> to vector<4x4x4xf32>
    %c0_26 = arith.constant 0 : index
    %c1_27 = arith.constant 1 : index
    %c0_28 = arith.constant 0 : index
    %c2_29 = arith.constant 2 : index
    %c0_30 = arith.constant 0 : index
    %18 = vector.load %arg2[%c0_26, %c1_27, %c0_28, %c2_29, %c0_30] : memref<1x4x4x4x16xf32, #tpu.memory_space<vmem>>, vector<1x1x4x1x16xf32>
    %19 = vector.shape_cast %18 : vector<1x1x4x1x16xf32> to vector<4x16xf32>
    %20 = vector.shape_cast %19 : vector<4x16xf32> to vector<4x4x4xf32>
    %c0_31 = arith.constant 0 : index
    %c1_32 = arith.constant 1 : index
    %c0_33 = arith.constant 0 : index
    %c3_34 = arith.constant 3 : index
    %c0_35 = arith.constant 0 : index
    %21 = vector.load %arg2[%c0_31, %c1_32, %c0_33, %c3_34, %c0_35] : memref<1x4x4x4x16xf32, #tpu.memory_space<vmem>>, vector<1x1x4x1x16xf32>
    %22 = vector.shape_cast %21 : vector<1x1x4x1x16xf32> to vector<4x16xf32>
    %23 = vector.shape_cast %22 : vector<4x16xf32> to vector<4x4x4xf32>
    %c0_36 = arith.constant 0 : index
    %c2_37 = arith.constant 2 : index
    %c0_38 = arith.constant 0 : index
    %c0_39 = arith.constant 0 : index
    %c0_40 = arith.constant 0 : index
    %24 = vector.load %arg2[%c0_36, %c2_37, %c0_38, %c0_39, %c0_40] : memref<1x4x4x4x16xf32, #tpu.memory_space<vmem>>, vector<1x1x4x1x16xf32>
    %25 = vector.shape_cast %24 : vector<1x1x4x1x16xf32> to vector<4x16xf32>
    %26 = vector.shape_cast %25 : vector<4x16xf32> to vector<4x4x4xf32>
    %c0_41 = arith.constant 0 : index
    %c2_42 = arith.constant 2 : index
    %c0_43 = arith.constant 0 : index
    %c1_44 = arith.constant 1 : index
    %c0_45 = arith.constant 0 : index
    %27 = vector.load %arg2[%c0_41, %c2_42, %c0_43, %c1_44, %c0_45] : memref<1x4x4x4x16xf32, #tpu.memory_space<vmem>>, vector<1x1x4x1x16xf32>
    %28 = vector.shape_cast %27 : vector<1x1x4x1x16xf32> to vector<4x16xf32>
    %29 = vector.shape_cast %28 : vector<4x16xf32> to vector<4x4x4xf32>
    %c0_46 = arith.constant 0 : index
    %c2_47 = arith.constant 2 : index
    %c0_48 = arith.constant 0 : index
    %c2_49 = arith.constant 2 : index
    %c0_50 = arith.constant 0 : index
    %30 = vector.load %arg2[%c0_46, %c2_47, %c0_48, %c2_49, %c0_50] : memref<1x4x4x4x16xf32, #tpu.memory_space<vmem>>, vector<1x1x4x1x16xf32>
    %31 = vector.shape_cast %30 : vector<1x1x4x1x16xf32> to vector<4x16xf32>
    %32 = vector.shape_cast %31 : vector<4x16xf32> to vector<4x4x4xf32>
    %c0_51 = arith.constant 0 : index
    %c2_52 = arith.constant 2 : index
    %c0_53 = arith.constant 0 : index
    %c3_54 = arith.constant 3 : index
    %c0_55 = arith.constant 0 : index
    %33 = vector.load %arg2[%c0_51, %c2_52, %c0_53, %c3_54, %c0_55] : memref<1x4x4x4x16xf32, #tpu.memory_space<vmem>>, vector<1x1x4x1x16xf32>
    %34 = vector.shape_cast %33 : vector<1x1x4x1x16xf32> to vector<4x16xf32>
    %35 = vector.shape_cast %34 : vector<4x16xf32> to vector<4x4x4xf32>
    %c0_56 = arith.constant 0 : index
    %c3_57 = arith.constant 3 : index
    %c0_58 = arith.constant 0 : index
    %c0_59 = arith.constant 0 : index
    %c0_60 = arith.constant 0 : index
    %36 = vector.load %arg2[%c0_56, %c3_57, %c0_58, %c0_59, %c0_60] : memref<1x4x4x4x16xf32, #tpu.memory_space<vmem>>, vector<1x1x4x1x16xf32>
    %37 = vector.shape_cast %36 : vector<1x1x4x1x16xf32> to vector<4x16xf32>
    %38 = vector.shape_cast %37 : vector<4x16xf32> to vector<4x4x4xf32>
    %c0_61 = arith.constant 0 : index
    %c3_62 = arith.constant 3 : index
    %c0_63 = arith.constant 0 : index
    %c1_64 = arith.constant 1 : index
    %c0_65 = arith.constant 0 : index
    %39 = vector.load %arg2[%c0_61, %c3_62, %c0_63, %c1_64, %c0_65] : memref<1x4x4x4x16xf32, #tpu.memory_space<vmem>>, vector<1x1x4x1x16xf32>
    %40 = vector.shape_cast %39 : vector<1x1x4x1x16xf32> to vector<4x16xf32>
    %41 = vector.shape_cast %40 : vector<4x16xf32> to vector<4x4x4xf32>
    %c0_66 = arith.constant 0 : index
    %c3_67 = arith.constant 3 : index
    %c0_68 = arith.constant 0 : index
    %c2_69 = arith.constant 2 : index
    %c0_70 = arith.constant 0 : index
    %42 = vector.load %arg2[%c0_66, %c3_67, %c0_68, %c2_69, %c0_70] : memref<1x4x4x4x16xf32, #tpu.memory_space<vmem>>, vector<1x1x4x1x16xf32>
    %43 = vector.shape_cast %42 : vector<1x1x4x1x16xf32> to vector<4x16xf32>
    %44 = vector.shape_cast %43 : vector<4x16xf32> to vector<4x4x4xf32>
    %c0_71 = arith.constant 0 : index
    %c3_72 = arith.constant 3 : index
    %c0_73 = arith.constant 0 : index
    %c3_74 = arith.constant 3 : index
    %c0_75 = arith.constant 0 : index
    %45 = vector.load %arg2[%c0_71, %c3_72, %c0_73, %c3_74, %c0_75] : memref<1x4x4x4x16xf32, #tpu.memory_space<vmem>>, vector<1x1x4x1x16xf32>
    %46 = vector.shape_cast %45 : vector<1x1x4x1x16xf32> to vector<4x16xf32>
    %47 = vector.shape_cast %46 : vector<4x16xf32> to vector<4x4x4xf32>
    %48 = tpu.concatenate %2, %5, %8, %11, %14, %17, %20, %23, %26, %29, %32, %35, %38, %41, %44, %47 in 2 : vector<4x4x4xf32>, vector<4x4x4xf32>, vector<4x4x4xf32>, vector<4x4x4xf32>, vector<4x4x4xf32>, vector<4x4x4xf32>, vector<4x4x4xf32>, vector<4x4x4xf32>, vector<4x4x4xf32>, vector<4x4x4xf32>, vector<4x4x4xf32>, vector<4x4x4xf32>, vector<4x4x4xf32>, vector<4x4x4xf32>, vector<4x4x4xf32>, vector<4x4x4xf32> -> vector<4x4x64xf32>
    %c0_76 = arith.constant 0 : index
    %c0_77 = arith.constant 0 : index
    %c0_78 = arith.constant 0 : index
    %c0_79 = arith.constant 0 : index
    %49 = vector.load %arg3[%c0_76, %c0_77, %c0_78, %c0_79] : memref<1x4x4x64xf32, #tpu.memory_space<vmem>>, vector<1x4x4x64xf32>
    %50 = vector.shape_cast %49 : vector<1x4x4x64xf32> to vector<4x4x64xf32>
    %51 = vector.shape_cast %48 : vector<4x4x64xf32> to vector<1x4x4x64xf32>
    tpu.vector_store %arg3[%c0_76, %c0_77, %c0_78, %c0_79], %51 {strides = array<i32>} : memref<1x4x4x64xf32, #tpu.memory_space<vmem>>, vector<1x4x4x64xf32>,
    return
  }
  func.func @transform_0(%arg0: i32, %arg1: i32) -> (i32, i32, i32, i32, i32) {
    %c0_i32 = arith.constant 0 : i32
    %c0_i32_0 = arith.constant 0 : i32
    %c0_i32_1 = arith.constant 0 : i32
    %c0_i32_2 = arith.constant 0 : i32
    return %arg0, %c0_i32, %arg1, %c0_i32_0, %c0_i32_1 : i32, i32, i32, i32, i32
  }
  func.func @transform_1(%arg0: i32, %arg1: i32) -> (i32, i32, i32, i32) {
    %c0_i32 = arith.constant 0 : i32
    %c0_i32_0 = arith.constant 0 : i32
    %c0_i32_1 = arith.constant 0 : i32
    return %arg0, %arg1, %c0_i32, %c0_i32_0 : i32, i32, i32, i32
  }
}

</mosaic_0001>

<bundles_post_ra>
// kernel: tpu_custom_call.1
= control target key start
LH: loop header
LB: loop body
LE: loop exit
PB: predicated region body
PF: predicated region fallthrough
CT: control target
= control target key end

     0   :  { %6 = vsyncpa [#allocation3], 0  ;;  %s4678_s0 = inlined_call_operand.hbm [shape: f32[2,4,4,4,16], index: 0, kind: input, shape index: {}]   ;;  %s4679_s1 = inlined_call_operand.hbm [shape: f32[2,4,4,64], index: 1, kind: output, shape index: {}]  }
   0x1   :  { %8 = vsyncpa [#allocation3 + $0x1], 0 }
   0x2   :  { %9 = vsyncpa [#allocation4], 0 }
   0x3   :  { %11 = vsyncpa [#allocation4 + $0x1], 0  ;;  %s3120_s6 = smov 0   ;;  %s3122_s7 = smov 0  }
   0x4   :  { %s3124_s8 = smov 0   ;;  %s3126_s9 = smov 0  }
   0x5   :  { %s3128_s10 = smov 0   ;;  %s3130_s11 = smov 0  }
   0x6 LB: > { %s2821_s12 = sadd.s32 4294967295, %s3083_s11   ;;  %s2822_s13 = sadd.s32 4294967294, %s3083_s11   ;;  %s3083_s11 = sphi %s3130_s11, %s17_s11   ;;  %s3079_s10 = sphi %s3128_s10, %s5013_s10   ;;  %s3075_s9 = sphi %s3126_s9, %s5012_s9   ;;  %s3071_s8 = sphi %s3124_s8, %s5011_s8   ;;  %s3067_s7 = sphi %s3122_s7, %s5010_s7   ;;  %s3063_s6 = sphi %s3120_s6, %s5009_s6  }
   0x7   : > { %s29_s14 = sadd.s32 1, %s3079_s10  ;;  %s38_s15 = sadd.s32 1, %s3071_s8 }
   0x8   : > { %p31_p0 = scmp.ge.s32.totalorder %s29_s14, 2  ;;  %p45_p1 = scmp.ne.s32.totalorder %s3071_s8, %s3067_s7 }
   0x9   : > { %p46_p2 = scmp.eq.s32.totalorder %s3083_s11, 0  ;;  %p51_p3 = scmp.ne.s32.totalorder %s3067_s7, %s3063_s6 }
   0xa   : > { %s5015_s14 = smov (%p31_p0, %s29_s14), 0  ;;  %p52_p5 = scmp.eq.s32.totalorder %s2821_s12, 0 }
   0xb   : > { %p3161_p4 = por %p46_p2, %p45_p1  ;;  %s33_s17 = ssub.s32 %s3079_s10, %s5015_s14 }
   0xc   : > { %p77_p6 = scmp.eq.s32.totalorder %s2821_s12, 1  ;;  %p36_p7 = scmp.eq.s32.totalorder %s33_s17, 0 }
   0xd   : > { %p3167_p8 = por %p52_p5, %p51_p3  ;;  %p83_p10 = scmp.eq.s32.totalorder %s2822_s13, 1 }
   0xe   : > { %p3171_p9 = por %p77_p6, %p45_p1  ;;  %p2898_p13 = scmp.lt.s32.totalorder %s3083_s11, 2 }
   0xf   : > { %s3176_s20 = scalar_select %p36_p7, %s3071_s8, %s38_s15  }
  0x10   : > { %p3178_p11 = por %p83_p10, %p51_p3  ;;  %s103_s22 = sand.u32 1, %s3071_s8  }
  0x11   : > { %s2825_s23 = sshll.u32 %s103_s22, 6  ;;  %s2884_s24 = sshll.u32 %s3079_s10, 10 }
  0x12   : > { %s115_s27 = scalar_lea.hbm %s4678_s0, %s2884_s24  ;;  %s107_s28 = scalar_lea.vmem [#allocation2], %s2825_s23 }
  0x13   : > { %s116_s29 = sshll.u32 %s107_s28, 4  ;;  %p3191_p0 = pnand %p2898_p13, %p3161_p4  ;;  %s117_s29 = int_to_ptr.vmem [resolvable:$true] %s116_s29 }
  0x14   : > { %p2828_p1 = scmp.ge.s32.totalorder %s3083_s11, 1  ;;  %s104_s2 = scalar_lea.sflag [#allocation3], %s103_s22 }
  0x15   : > { %p2977_p2 = pneg %p3191_p0  ;;  %s2988_s3 = scalar_lea.vmem %s117_s29, 1024 }
  0x16   : > { %p2989_p3 = scmp.ne.s32.totalorder %s117_s29, %s2988_s3  ;;  %s3085_s4 = smov [#allocation2]  }
  0x17   : > { %s2993_s5 = sshll.u32 %s3085_s4, 4  ;;  %s2994_s5 = int_to_ptr.vmem [resolvable:$false] %s2993_s5 }
  0x18   : > { %p2991_p5 = pnand %p2989_p3, %p2977_p2  ;;  %s2995_s12 = scalar_lea.vmem %s2994_s5, 2048 }
  0x19   : > { %p2996_p7 = scmp.lt.s32.totalorder %s117_s29, %s2994_s5  ;;  %p2997_p10 = scmp.lt.s32.totalorder %s2995_s12, %s2988_s3 }
  0x1a   : > { %p2992_p6 = pneg %p2991_p5 }
  0x1b   : > { %p2998_p12 = por %p2997_p10, %p2996_p7 }
  0x1d   : > { %p2999_p4 = pnand %p2998_p12, %p2992_p6 }
  0x1f   : > { %3002 = shalt.err (!%p2999_p4)
}
  0x20   : > { %s3086_s13 = smov 64   ;;  %s3087_s15 = smov 4  }
  0x21   : > { %2893 = dma.hbm_to_vmem [thread:$0]  (!%p3191_p0), %s115_s27, 1024, %s117_s29, %s104_s2, %s3086_s13, %s3086_s13, %s3087_s15  }
  0x22   : > { %p124_p13 = scmp.lt.s32.totalorder %s3083_s11, 3 }
  0x24   : > { %p125_p2 = pnand %p2828_p1, %p124_p13 }
  0x26   : > { %128 = sbr.rel (%p125_p2) target bundleno = 681 (0x2a9), region = 24 }
  0x2b   : > { %s3204_s16 = sand.u32 1, %s3067_s7  }
  0x2c   : > { %s2829_s17 = sshll.u32 %s3204_s16, 6  ;;  %s131_s22 = scalar_lea.sflag [#allocation3], %s3204_s16 }
  0x2d   : > { %s3208_s23 = scalar_lea.vmem [#allocation2], %s2829_s17 }
  0x2e   : > { %3054 = dma.done.wait (%p3167_p8), %s131_s22, 1024  }
  0x2f   : > { %3056 = vsyncadd (%p3167_p8), %s131_s22, 4294966272  ;;  %v157_v0 = vld [vmem:[%s3208_s23 + $0x8] sm:$0x1]  ;;  %v155_v1 = vld [vmem:[%s3208_s23] sm:$0x1]  ;;  %s3088_s24 = smov 124  }
  0x30   : > { %167 = vrot.lane.b32.xlu1 %v157_v0, %s3088_s24  ;;  %163 = vrot.lane.b32.xlu0 %v155_v1, %s3088_s24  ;;  %v158_v2 = vld [vmem:[%s3208_s23 + $0xc] sm:$0x1]  ;;  %v156_v3 = vld [vmem:[%s3208_s23 + $0x4] sm:$0x1]  ;;  %s3089_s18 = smov 120   ;;  %s3090_s25 = smov 116  }
  0x31   : > { %v3231_v4 = vld [vmem:[%s3208_s23 + $0x5] sm:$0x1]  ;;  %v3234_v5 = vld [vmem:[%s3208_s23 + $0x1] sm:$0x1]  ;;  %v3241_v6 = vld [vmem:[%s3208_s23 + $0xd] sm:$0x1] }
  0x32   : > { %v3244_v7 = vld [vmem:[%s3208_s23 + $0x9] sm:$0x1]  ;;  %v3267_v8 = vld [vmem:[%s3208_s23 + $0x6] sm:$0x1]  ;;  %v3270_v9 = vld [vmem:[%s3208_s23 + $0x2] sm:$0x1] }
  0x33   : > { %v3277_v10 = vld [vmem:[%s3208_s23 + $0xe] sm:$0x1]  ;;  %v3280_v11 = vld [vmem:[%s3208_s23 + $0xa] sm:$0x1]  ;;  %v3303_v12 = vld [vmem:[%s3208_s23 + $0x7] sm:$0x1] }
  0x34   : > { %169 = vrot.lane.b32.xlu1 %v158_v2, %s3088_s24  ;;  %165 = vrot.lane.b32.xlu0 %v156_v3, %s3088_s24  ;;  %v3306_v13 = vld [vmem:[%s3208_s23 + $0x3] sm:$0x1]  ;;  %v3313_v14 = vld [vmem:[%s3208_s23 + $0xf] sm:$0x1]  ;;  %s3093_s26 = smov 4   ;;  %s3094_s27 = smov 8  }
  0x35   : > { %v3316_v15 = vld [vmem:[%s3208_s23 + $0xb] sm:$0x1]  ;;  %v3339_v16 = vld [vmem:[%s3208_s23 + $0x14] sm:$0x1]  ;;  %v3342_v17 = vld [vmem:[%s3208_s23 + $0x10] sm:$0x1] }
  0x36   : > { %4732 = vst [vmem:[#allocation8_spill] sm:$0xff] %v3339_v16  ;;  %4733 = vst [vmem:[#allocation9_spill] sm:$0xff] %v3342_v17  ;;  %v3349_v18 = vld [vmem:[%s3208_s23 + $0x1c] sm:$0x1]  ;;  %v3352_v19 = vld [vmem:[%s3208_s23 + $0x18] sm:$0x1] }
  0x37   : > { %4734 = vst [vmem:[#allocation10_spill] sm:$0xff] %v3349_v18  ;;  %4735 = vst [vmem:[#allocation11_spill] sm:$0xff] %v3352_v19  ;;  %v3379_v22 = vld [vmem:[%s3208_s23 + $0x15] sm:$0x1]  ;;  %v3382_v23 = vld [vmem:[%s3208_s23 + $0x11] sm:$0x1] }
  0x38   : > { %177 = vrot.lane.b32.xlu1 %v156_v3, %s3089_s18  ;;  %175 = vrot.lane.b32.xlu0 %v155_v1, %s3089_s18  ;;  %4738 = vst [vmem:[#allocation14_spill] sm:$0xff] %v3379_v22  ;;  %4739 = vst [vmem:[#allocation15_spill] sm:$0xff] %v3382_v23  ;;  %v3393_v26 = vld [vmem:[%s3208_s23 + $0x1d] sm:$0x1]  ;;  %v3396_v27 = vld [vmem:[%s3208_s23 + $0x19] sm:$0x1] }
  0x39   : > { %4742 = vst [vmem:[#allocation18_spill] sm:$0xff] %v3393_v26  ;;  %4743 = vst [vmem:[#allocation19_spill] sm:$0xff] %v3396_v27  ;;  %v3439_v38 = vld [vmem:[%s3208_s23 + $0x16] sm:$0x1]  ;;  %v3442_v39 = vld [vmem:[%s3208_s23 + $0x12] sm:$0x1] }
  0x3a   : > { %4752 = vst [vmem:[#allocation28_spill] sm:$0xff] %v3439_v38  ;;  %4753 = vst [vmem:[#allocation29_spill] sm:$0xff] %v3442_v39  ;;  %v3453_v42 = vld [vmem:[%s3208_s23 + $0x1e] sm:$0x1]  ;;  %v3456_v43 = vld [vmem:[%s3208_s23 + $0x1a] sm:$0x1] }
  0x3b   : > { %4754 = vst [vmem:[#allocation30_spill] sm:$0xff] %v3453_v42  ;;  %4755 = vst [vmem:[#allocation31_spill] sm:$0xff] %v3456_v43  ;;  %v3499_v54 = vld [vmem:[%s3208_s23 + $0x17] sm:$0x1]  ;;  %v3502_v55 = vld [vmem:[%s3208_s23 + $0x13] sm:$0x1] }
  0x3c   : > { %181 = vrot.lane.b32.xlu1 %v158_v2, %s3089_s18  ;;  %179 = vrot.lane.b32.xlu0 %v157_v0, %s3089_s18  ;;  %4756 = vst [vmem:[#allocation32_spill] sm:$0xff] %v3499_v54  ;;  %4757 = vst [vmem:[#allocation33_spill] sm:$0xff] %v3502_v55  ;;  %v3513_v58 = vld [vmem:[%s3208_s23 + $0x1f] sm:$0x1]  ;;  %v3516_v59 = vld [vmem:[%s3208_s23 + $0x1b] sm:$0x1] }
  0x3d   : > { %4758 = vst [vmem:[#allocation34_spill] sm:$0xff] %v3513_v58  ;;  %4759 = vst [vmem:[#allocation35_spill] sm:$0xff] %v3516_v59  ;;  %s3095_s28 = smov 12   ;;  %s3096_s29 = smov 16   ;;  %vm2638_vm0 = vcmask 31744   ;;  %vm2643_vm1 = vcmask 64512  }
  0x3e   : > { %s3097_s30 = smov 20   ;;  %s3098_s2 = smov 24   ;;  %vm2648_vm2 = vcmask 97280   ;;  %vm2653_vm3 = vcmask 130048   ;;  %vm2658_vm4 = vcmask 162816   ;;  %vm2663_vm5 = vcmask 195584  }
  0x3f   : > { %s3099_s3 = smov 28   ;;  %s3100_s4 = smov 32   ;;  %vm2668_vm6 = vcmask 228352   ;;  %vm2673_vm7 = vcmask 261120   ;;  %vm2678_vm8 = vcmask 293888   ;;  %vm2683_vm9 = vcmask 326656  }
  0x40   : > { %189 = vrot.lane.b32.xlu1 %v156_v3, %s3090_s25  ;;  %187 = vrot.lane.b32.xlu0 %v155_v1, %s3090_s25  ;;  %s3101_s5 = smov 36   ;;  %s3102_s12 = smov 40   ;;  %vm2688_vm10 = vcmask 359424   ;;  %vm2693_vm11 = vcmask 392192   ;;  %vm2698_vm12 = vcmask 424960   ;;  %vm2703_vm13 = vcmask 457728  }
  0x41   : > { %s3103_s13 = smov 44   ;;  %s3104_s15 = smov 48   ;;  %vm2708_vm14 = vcmask 490496   ;;  %vm2713_vm15 = vcmask 519168  }
  0x42   : > { %s3105_s17 = smov 52   ;;  %s3106_s22 = smov 56  }
  0x44   : > { %193 = vrot.lane.b32.xlu1 %v158_v2, %s3090_s25  ;;  %191 = vrot.lane.b32.xlu0 %v157_v0, %s3090_s25 }
  0x48   : > { %305 = vrot.lane.b32.xlu1 %v3231_v4, %s3088_s24  ;;  %303 = vrot.lane.b32.xlu0 %v3234_v5, %s3088_s24 }
  0x4c   : > { %309 = vrot.lane.b32.xlu1 %v3241_v6, %s3088_s24  ;;  %307 = vrot.lane.b32.xlu0 %v3244_v7, %s3088_s24 }
  0x50   : > { %317 = vrot.lane.b32.xlu1 %v3231_v4, %s3089_s18  ;;  %315 = vrot.lane.b32.xlu0 %v3234_v5, %s3089_s18 }
  0x54   : > { %321 = vrot.lane.b32.xlu1 %v3241_v6, %s3089_s18  ;;  %319 = vrot.lane.b32.xlu0 %v3244_v7, %s3089_s18 }
  0x58   : > { %329 = vrot.lane.b32.xlu1 %v3231_v4, %s3090_s25  ;;  %327 = vrot.lane.b32.xlu0 %v3234_v5, %s3090_s25 }
  0x5c   : > { %333 = vrot.lane.b32.xlu1 %v3241_v6, %s3090_s25  ;;  %331 = vrot.lane.b32.xlu0 %v3244_v7, %s3090_s25 }
  0x60   : > { %445 = vrot.lane.b32.xlu1 %v3267_v8, %s3088_s24  ;;  %443 = vrot.lane.b32.xlu0 %v3270_v9, %s3088_s24 }
  0x64   : > { %449 = vrot.lane.b32.xlu1 %v3277_v10, %s3088_s24  ;;  %447 = vrot.lane.b32.xlu0 %v3280_v11, %s3088_s24 }
  0x68   : > { %457 = vrot.lane.b32.xlu1 %v3267_v8, %s3089_s18  ;;  %455 = vrot.lane.b32.xlu0 %v3270_v9, %s3089_s18 }
  0x6c   : > { %461 = vrot.lane.b32.xlu1 %v3277_v10, %s3089_s18  ;;  %459 = vrot.lane.b32.xlu0 %v3280_v11, %s3089_s18 }
  0x70   : > { %469 = vrot.lane.b32.xlu1 %v3267_v8, %s3090_s25  ;;  %467 = vrot.lane.b32.xlu0 %v3270_v9, %s3090_s25 }
  0x74   : > { %473 = vrot.lane.b32.xlu1 %v3277_v10, %s3090_s25  ;;  %471 = vrot.lane.b32.xlu0 %v3280_v11, %s3090_s25 }
  0x78   : > { %585 = vrot.lane.b32.xlu1 %v3303_v12, %s3088_s24  ;;  %583 = vrot.lane.b32.xlu0 %v3306_v13, %s3088_s24 }
  0x7c   : > { %589 = vrot.lane.b32.xlu1 %v3313_v14, %s3088_s24  ;;  %587 = vrot.lane.b32.xlu0 %v3316_v15, %s3088_s24 }
  0x80   : > { %597 = vrot.lane.b32.xlu1 %v3303_v12, %s3089_s18  ;;  %595 = vrot.lane.b32.xlu0 %v3306_v13, %s3089_s18 }
  0x84   : > { %601 = vrot.lane.b32.xlu1 %v3313_v14, %s3089_s18  ;;  %599 = vrot.lane.b32.xlu0 %v3316_v15, %s3089_s18 }
  0x88   : > { %609 = vrot.lane.b32.xlu1 %v3303_v12, %s3090_s25  ;;  %607 = vrot.lane.b32.xlu0 %v3306_v13, %s3090_s25 }
  0x8c   : > { %613 = vrot.lane.b32.xlu1 %v3313_v14, %s3090_s25  ;;  %611 = vrot.lane.b32.xlu0 %v3316_v15, %s3090_s25 }
  0x90   : > { %726 = vrot.lane.b32.xlu1 %v3339_v16, %s3088_s24  ;;  %724 = vrot.lane.b32.xlu0 %v3342_v17, %s3088_s24 }
  0x94   : > { %730 = vrot.lane.b32.xlu1 %v3349_v18, %s3088_s24  ;;  %728 = vrot.lane.b32.xlu0 %v3352_v19, %s3088_s24 }
  0x98   : > { %738 = vrot.lane.b32.xlu1 %v3339_v16, %s3089_s18  ;;  %736 = vrot.lane.b32.xlu0 %v3342_v17, %s3089_s18 }
  0x9c   : > { %742 = vrot.lane.b32.xlu1 %v3349_v18, %s3089_s18  ;;  %740 = vrot.lane.b32.xlu0 %v3352_v19, %s3089_s18 }
  0xa0   : > { %750 = vrot.lane.b32.xlu1 %v3339_v16, %s3090_s25  ;;  %748 = vrot.lane.b32.xlu0 %v3342_v17, %s3090_s25  ;;  %v3679_v17 = vld [vmem:[%s3208_s23 + $0x26] sm:$0x1]  ;;  %v203_v16 = vlaneseq }
  0xa1   : > { %4781 = vst [vmem:[#allocation57_spill] sm:$0xff] %v3679_v17 }
  0xa2   : > { %v3370_v20 = vpop.permute.xlu1 %167  ;;  %v3372_v21 = vpop.permute.xlu0 %163 }
  0xa3   : > { %4736 = vst [vmem:[#allocation12_spill] sm:$0xff] %v3370_v20  ;;  %4737 = vst [vmem:[#allocation13_spill] sm:$0xff] %v3372_v21  ;;  %v3559_v20 = vld [vmem:[%s3208_s23 + $0x24] sm:$0x1]  ;;  %v3576_v21 = vld [vmem:[%s3208_s23 + $0x28] sm:$0x1] }
  0xa4   : > { %754 = vrot.lane.b32.xlu1 %v3349_v18, %s3090_s25  ;;  %752 = vrot.lane.b32.xlu0 %v3352_v19, %s3090_s25  ;;  %4760 = vst [vmem:[#allocation36_spill] sm:$0xff] %v3559_v20  ;;  %4763 = vst [vmem:[#allocation39_spill] sm:$0xff] %v3576_v21 }
  0xa6   : > { %v3384_v24 = vpop.permute.xlu1 %169  ;;  %v3386_v25 = vpop.permute.xlu0 %165 }
  0xa7   : > { %4740 = vst [vmem:[#allocation16_spill] sm:$0xff] %v3384_v24  ;;  %4741 = vst [vmem:[#allocation17_spill] sm:$0xff] %v3386_v25 }
  0xa8   : > { %866 = vrot.lane.b32.xlu1 %v3379_v22, %s3088_s24  ;;  %864 = vrot.lane.b32.xlu0 %v3382_v23, %s3088_s24 }
  0xaa   : > { %v3398_v28 = vpop.permute.xlu1 %177  ;;  %v3400_v29 = vpop.permute.xlu0 %175 }
  0xab   : > { %4744 = vst [vmem:[#allocation20_spill] sm:$0xff] %v3398_v28  ;;  %4745 = vst [vmem:[#allocation21_spill] sm:$0xff] %v3400_v29  ;;  %v3573_v29 = vld [vmem:[%s3208_s23 + $0x2c] sm:$0x1] }
  0xac   : > { %870 = vrot.lane.b32.xlu1 %v3393_v26, %s3088_s24  ;;  %868 = vrot.lane.b32.xlu0 %v3396_v27, %s3088_s24  ;;  %4762 = vst [vmem:[#allocation38_spill] sm:$0xff] %v3573_v29 }
  0xae   : > { %v3406_v30 = vpop.permute.xlu1 %181  ;;  %v3408_v31 = vpop.permute.xlu0 %179 }
  0xaf   : > { %4746 = vst [vmem:[#allocation22_spill] sm:$0xff] %v3406_v30  ;;  %4747 = vst [vmem:[#allocation23_spill] sm:$0xff] %v3408_v31 }
  0xb0   : > { %878 = vrot.lane.b32.xlu1 %v3379_v22, %s3089_s18  ;;  %876 = vrot.lane.b32.xlu0 %v3382_v23, %s3089_s18 }
  0xb2   : > { %v3414_v32 = vpop.permute.xlu1 %189  ;;  %v3416_v33 = vpop.permute.xlu0 %187 }
  0xb3   : > { %4748 = vst [vmem:[#allocation24_spill] sm:$0xff] %v3414_v32  ;;  %4749 = vst [vmem:[#allocation25_spill] sm:$0xff] %v3416_v33 }
  0xb4   : > { %882 = vrot.lane.b32.xlu1 %v3393_v26, %s3089_s18  ;;  %880 = vrot.lane.b32.xlu0 %v3396_v27, %s3089_s18 }
  0xb6   : > { %v3422_v34 = vpop.permute.xlu1 %193  ;;  %v3424_v35 = vpop.permute.xlu0 %191 }
  0xb7   : > { %4750 = vst [vmem:[#allocation26_spill] sm:$0xff] %v3422_v34  ;;  %4751 = vst [vmem:[#allocation27_spill] sm:$0xff] %v3424_v35  ;;  %v3562_v35 = vld [vmem:[%s3208_s23 + $0x20] sm:$0x1] }
  0xb8   : > { %890 = vrot.lane.b32.xlu1 %v3379_v22, %s3090_s25  ;;  %888 = vrot.lane.b32.xlu0 %v3382_v23, %s3090_s25  ;;  %4761 = vst [vmem:[#allocation37_spill] sm:$0xff] %v3562_v35 }
  0xba   : > { %v3430_v36 = vpop.permute.xlu1 %305  ;;  %v3432_v37 = vpop.permute.xlu0 %303 }
  0xbc   : > { %894 = vrot.lane.b32.xlu1 %v3393_v26, %s3090_s25  ;;  %892 = vrot.lane.b32.xlu0 %v3396_v27, %s3090_s25 }
  0xbe   : > { %v3444_v40 = vpop.permute.xlu1 %309  ;;  %v3446_v41 = vpop.permute.xlu0 %307 }
  0xc0   : > { %1006 = vrot.lane.b32.xlu1 %v3439_v38, %s3088_s24  ;;  %1004 = vrot.lane.b32.xlu0 %v3442_v39, %s3088_s24 }
  0xc2   : > { %v3458_v44 = vpop.permute.xlu1 %317  ;;  %v3460_v45 = vpop.permute.xlu0 %315 }
  0xc4   : > { %1010 = vrot.lane.b32.xlu1 %v3453_v42, %s3088_s24  ;;  %1008 = vrot.lane.b32.xlu0 %v3456_v43, %s3088_s24 }
  0xc6   : > { %v3466_v46 = vpop.permute.xlu1 %321  ;;  %v3468_v47 = vpop.permute.xlu0 %319 }
  0xc8   : > { %1018 = vrot.lane.b32.xlu1 %v3439_v38, %s3089_s18  ;;  %1016 = vrot.lane.b32.xlu0 %v3442_v39, %s3089_s18 }
  0xca   : > { %v3474_v48 = vpop.permute.xlu1 %329  ;;  %v3476_v49 = vpop.permute.xlu0 %327 }
  0xcc   : > { %1022 = vrot.lane.b32.xlu1 %v3453_v42, %s3089_s18  ;;  %1020 = vrot.lane.b32.xlu0 %v3456_v43, %s3089_s18 }
  0xce   : > { %v3482_v50 = vpop.permute.xlu1 %333  ;;  %v3484_v51 = vpop.permute.xlu0 %331 }
  0xd0   : > { %1030 = vrot.lane.b32.xlu1 %v3439_v38, %s3090_s25  ;;  %1028 = vrot.lane.b32.xlu0 %v3442_v39, %s3090_s25  ;;  %v3619_v39 = vld [vmem:[%s3208_s23 + $0x25] sm:$0x1]  ;;  %v3622_v38 = vld [vmem:[%s3208_s23 + $0x21] sm:$0x1] }
  0xd1   : > { %4766 = vst [vmem:[#allocation42_spill] sm:$0xff] %v3619_v39  ;;  %4767 = vst [vmem:[#allocation43_spill] sm:$0xff] %v3622_v38 }
  0xd2   : > { %v3490_v52 = vpop.permute.xlu1 %445  ;;  %v3492_v53 = vpop.permute.xlu0 %443 }
  0xd4   : > { %1034 = vrot.lane.b32.xlu1 %v3453_v42, %s3090_s25  ;;  %1032 = vrot.lane.b32.xlu0 %v3456_v43, %s3090_s25 }
  0xd6   : > { %v3504_v56 = vpop.permute.xlu1 %449  ;;  %v3506_v57 = vpop.permute.xlu0 %447 }
  0xd8   : > { %1146 = vrot.lane.b32.xlu1 %v3499_v54, %s3088_s24  ;;  %1144 = vrot.lane.b32.xlu0 %v3502_v55, %s3088_s24 }
  0xda   : > { %v3518_v60 = vpop.permute.xlu1 %457  ;;  %v3520_v61 = vpop.permute.xlu0 %455 }
  0xdc   : > { %1150 = vrot.lane.b32.xlu1 %v3513_v58, %s3088_s24  ;;  %1148 = vrot.lane.b32.xlu0 %v3516_v59, %s3088_s24 }
  0xde   : > { %v3526_v62 = vpop.permute.xlu1 %461  ;;  %v3528_v63 = vpop.permute.xlu0 %459 }
  0xe0   : > { %1158 = vrot.lane.b32.xlu1 %v3499_v54, %s3089_s18  ;;  %1156 = vrot.lane.b32.xlu0 %v3502_v55, %s3089_s18 }
  0xe2   : > { %v3534_v0 = vpop.permute.xlu1 %469  ;;  %v3536_v1 = vpop.permute.xlu0 %467 }
  0xe4   : > { %1162 = vrot.lane.b32.xlu1 %v3513_v58, %s3089_s18  ;;  %1160 = vrot.lane.b32.xlu0 %v3516_v59, %s3089_s18 }
  0xe6   : > { %v3542_v2 = vpop.permute.xlu1 %473  ;;  %v3544_v3 = vpop.permute.xlu0 %471 }
  0xe8   : > { %1170 = vrot.lane.b32.xlu1 %v3499_v54, %s3090_s25  ;;  %1168 = vrot.lane.b32.xlu0 %v3502_v55, %s3090_s25 }
  0xea   : > { %v3550_v31 = vpop.permute.xlu1 %585  ;;  %v3552_v30 = vpop.permute.xlu0 %583 }
  0xec   : > { %1174 = vrot.lane.b32.xlu1 %v3513_v58, %s3090_s25  ;;  %1172 = vrot.lane.b32.xlu0 %v3516_v59, %s3090_s25 }
  0xee   : > { %v3564_v24 = vpop.permute.xlu1 %589  ;;  %v3566_v34 = vpop.permute.xlu0 %587 }
  0xf0   : > { %1287 = vrot.lane.b32.xlu1 %v3559_v20, %s3088_s24  ;;  %1285 = vrot.lane.b32.xlu0 %v3562_v35, %s3088_s24 }
  0xf2   : > { %v3578_v33 = vpop.permute.xlu1 %597  ;;  %v3580_v25 = vpop.permute.xlu0 %595 }
  0xf4   : > { %1291 = vrot.lane.b32.xlu1 %v3573_v29, %s3088_s24  ;;  %1289 = vrot.lane.b32.xlu0 %v3576_v21, %s3088_s24 }
  0xf6   : > { %v3586_v32 = vpop.permute.xlu1 %601  ;;  %v3588_v28 = vpop.permute.xlu0 %599 }
  0xf8   : > { %1299 = vrot.lane.b32.xlu1 %v3559_v20, %s3089_s18  ;;  %1297 = vrot.lane.b32.xlu0 %v3562_v35, %s3089_s18 }
  0xfa   : > { %v3594_v59 = vpop.permute.xlu1 %609  ;;  %v3596_v58 = vpop.permute.xlu0 %607 }
  0xfc   : > { %1303 = vrot.lane.b32.xlu1 %v3573_v29, %s3089_s18  ;;  %1301 = vrot.lane.b32.xlu0 %v3576_v21, %s3089_s18 }
  0xfe   : > { %v3602_v55 = vpop.permute.xlu1 %613  ;;  %v3604_v54 = vpop.permute.xlu0 %611 }
 0x100   : > { %1311 = vrot.lane.b32.xlu1 %v3559_v20, %s3090_s25  ;;  %1309 = vrot.lane.b32.xlu0 %v3562_v35, %s3090_s25  ;;  %v3633_v35 = vld [vmem:[%s3208_s23 + $0x2d] sm:$0x1] }
 0x101   : > { %4770 = vst [vmem:[#allocation46_spill] sm:$0xff] %v3633_v35 }
 0x102   : > { %v3610_v43 = vpop.permute.xlu1 %726  ;;  %v3612_v42 = vpop.permute.xlu0 %724 }
 0x103   : > { %4764 = vst [vmem:[#allocation40_spill] sm:$0xff] %v3610_v43  ;;  %4765 = vst [vmem:[#allocation41_spill] sm:$0xff] %v3612_v42  ;;  %v204_v42 = vshrl.u32 %v203_v16, 7  ;;  %v363_v16 = vcombine.low %v3231_v4, %v3458_v44  ;;  %v339_v43 = vcombine.low %v3234_v5, %v3460_v45 }
 0x104   : > { %1315 = vrot.lane.b32.xlu1 %v3573_v29, %s3090_s25  ;;  %1313 = vrot.lane.b32.xlu0 %v3576_v21, %s3090_s25  ;;  %v3636_v29 = vld [vmem:[%s3208_s23 + $0x29] sm:$0x1] }
 0x105   : > { %4771 = vst [vmem:[#allocation47_spill] sm:$0xff] %v3636_v29 }
 0x106   : > { %v3624_v27 = vpop.permute.xlu1 %730  ;;  %v3626_v20 = vpop.permute.xlu0 %728 }
 0x107   : > { %4768 = vst [vmem:[#allocation44_spill] sm:$0xff] %v3624_v27  ;;  %4769 = vst [vmem:[#allocation45_spill] sm:$0xff] %v3626_v20 }
 0x108   : > { %1427 = vrot.lane.b32.xlu1 %v3619_v39, %s3088_s24  ;;  %1425 = vrot.lane.b32.xlu0 %v3622_v38, %s3088_s24 }
 0x10a   : > { %v3638_v26 = vpop.permute.xlu1 %738  ;;  %v3640_v21 = vpop.permute.xlu0 %736 }
 0x10b   : > { %4772 = vst [vmem:[#allocation48_spill] sm:$0xff] %v3638_v26  ;;  %4773 = vst [vmem:[#allocation49_spill] sm:$0xff] %v3640_v21 }
 0x10c   : > { %1431 = vrot.lane.b32.xlu1 %v3633_v35, %s3088_s24  ;;  %1429 = vrot.lane.b32.xlu0 %v3636_v29, %s3088_s24 }
 0x10e   : > { %v3646_v23 = vpop.permute.xlu1 %742  ;;  %v3648_v22 = vpop.permute.xlu0 %740 }
 0x10f   : > { %4774 = vst [vmem:[#allocation50_spill] sm:$0xff] %v3646_v23  ;;  %4775 = vst [vmem:[#allocation51_spill] sm:$0xff] %v3648_v22 }
 0x110   : > { %1439 = vrot.lane.b32.xlu1 %v3619_v39, %s3089_s18  ;;  %1437 = vrot.lane.b32.xlu0 %v3622_v38, %s3089_s18 }
 0x112   : > { %v3654_v19 = vpop.permute.xlu1 %750  ;;  %v3656_v18 = vpop.permute.xlu0 %748 }
 0x113   : > { %4776 = vst [vmem:[#allocation52_spill] sm:$0xff] %v3656_v18 }
 0x114   : > { %1443 = vrot.lane.b32.xlu1 %v3633_v35, %s3089_s18  ;;  %1441 = vrot.lane.b32.xlu0 %v3636_v29, %s3089_s18 }
 0x116   : > { %v3662_v22 = vpop.permute.xlu1 %754  ;;  %v3664_v23 = vpop.permute.xlu0 %752 }
 0x117   : > { %4777 = vst [vmem:[#allocation53_spill] sm:$0xff] %v3662_v22  ;;  %4778 = vst [vmem:[#allocation54_spill] sm:$0xff] %v3664_v23  ;;  %v3682_v22 = vld [vmem:[%s3208_s23 + $0x22] sm:$0x1] }
 0x118   : > { %1451 = vrot.lane.b32.xlu1 %v3619_v39, %s3090_s25  ;;  %1449 = vrot.lane.b32.xlu0 %v3622_v38, %s3090_s25  ;;  %4782 = vst [vmem:[#allocation58_spill] sm:$0xff] %v3682_v22  ;;  %v3693_v38 = vld [vmem:[%s3208_s23 + $0x2e] sm:$0x1] }
 0x119   : > { %4785 = vst [vmem:[#allocation61_spill] sm:$0xff] %v3693_v38 }
 0x11a   : > { %v3670_v20 = vpop.permute.xlu1 %866  ;;  %v3672_v27 = vpop.permute.xlu0 %864 }
 0x11b   : > { %4779 = vst [vmem:[#allocation55_spill] sm:$0xff] %v3670_v20  ;;  %4780 = vst [vmem:[#allocation56_spill] sm:$0xff] %v3672_v27 }
 0x11c   : > { %1455 = vrot.lane.b32.xlu1 %v3633_v35, %s3090_s25  ;;  %1453 = vrot.lane.b32.xlu0 %v3636_v29, %s3090_s25  ;;  %v3696_v35 = vld [vmem:[%s3208_s23 + $0x2a] sm:$0x1] }
 0x11d   : > { %4786 = vst [vmem:[#allocation62_spill] sm:$0xff] %v3696_v35 }
 0x11e   : > { %v3684_v23 = vpop.permute.xlu1 %870  ;;  %v3686_v39 = vpop.permute.xlu0 %868 }
 0x11f   : > { %4783 = vst [vmem:[#allocation59_spill] sm:$0xff] %v3684_v23  ;;  %4784 = vst [vmem:[#allocation60_spill] sm:$0xff] %v3686_v39 }
 0x120   : > { %1567 = vrot.lane.b32.xlu1 %v3679_v17, %s3088_s24  ;;  %1565 = vrot.lane.b32.xlu0 %v3682_v22, %s3088_s24 }
 0x122   : > { %v3698_v27 = vpop.permute.xlu1 %878  ;;  %v3700_v29 = vpop.permute.xlu0 %876 }
 0x123   : > { %4787 = vst [vmem:[#allocation63_spill] sm:$0xff] %v3698_v27  ;;  %4788 = vst [vmem:[#allocation64_spill] sm:$0xff] %v3700_v29 }
 0x124   : > { %1571 = vrot.lane.b32.xlu1 %v3693_v38, %s3088_s24  ;;  %1569 = vrot.lane.b32.xlu0 %v3696_v35, %s3088_s24 }
 0x126   : > { %v3706_v39 = vpop.permute.xlu1 %882  ;;  %v3708_v23 = vpop.permute.xlu0 %880 }
 0x127   : > { %4789 = vst [vmem:[#allocation65_spill] sm:$0xff] %v3706_v39  ;;  %4790 = vst [vmem:[#allocation66_spill] sm:$0xff] %v3708_v23 }
 0x128   : > { %1579 = vrot.lane.b32.xlu1 %v3679_v17, %s3089_s18  ;;  %1577 = vrot.lane.b32.xlu0 %v3682_v22, %s3089_s18 }
 0x12a   : > { %v3714_v27 = vpop.permute.xlu1 %890  ;;  %v3716_v29 = vpop.permute.xlu0 %888 }
 0x12b   : > { %4791 = vst [vmem:[#allocation67_spill] sm:$0xff] %v3714_v27  ;;  %4792 = vst [vmem:[#allocation68_spill] sm:$0xff] %v3716_v29  ;;  %v3739_v27 = vld [vmem:[%s3208_s23 + $0x27] sm:$0x1] }
 0x12c   : > { %1583 = vrot.lane.b32.xlu1 %v3693_v38, %s3089_s18  ;;  %1581 = vrot.lane.b32.xlu0 %v3696_v35, %s3089_s18  ;;  %4797 = vst [vmem:[#allocation73_spill] sm:$0xff] %v3739_v27 }
 0x12e   : > { %v3722_v23 = vpop.permute.xlu1 %894  ;;  %v3724_v39 = vpop.permute.xlu0 %892 }
 0x12f   : > { %4793 = vst [vmem:[#allocation69_spill] sm:$0xff] %v3722_v23  ;;  %4794 = vst [vmem:[#allocation70_spill] sm:$0xff] %v3724_v39  ;;  %v3742_v23 = vld [vmem:[%s3208_s23 + $0x23] sm:$0x1] }
 0x130   : > { %1591 = vrot.lane.b32.xlu1 %v3679_v17, %s3090_s25  ;;  %1589 = vrot.lane.b32.xlu0 %v3682_v22, %s3090_s25  ;;  %4798 = vst [vmem:[#allocation74_spill] sm:$0xff] %v3742_v23  ;;  %v3753_v22 = vld [vmem:[%s3208_s23 + $0x2f] sm:$0x1] }
 0x131   : > { %4801 = vst [vmem:[#allocation77_spill] sm:$0xff] %v3753_v22 }
 0x132   : > { %v3730_v20 = vpop.permute.xlu1 %1006  ;;  %v3732_v29 = vpop.permute.xlu0 %1004 }
 0x133   : > { %4795 = vst [vmem:[#allocation71_spill] sm:$0xff] %v3730_v20  ;;  %4796 = vst [vmem:[#allocation72_spill] sm:$0xff] %v3732_v29 }
 0x134   : > { %1595 = vrot.lane.b32.xlu1 %v3693_v38, %s3090_s25  ;;  %1593 = vrot.lane.b32.xlu0 %v3696_v35, %s3090_s25  ;;  %v3756_v38 = vld [vmem:[%s3208_s23 + $0x2b] sm:$0x1] }
 0x135   : > { %4802 = vst [vmem:[#allocation78_spill] sm:$0xff] %v3756_v38 }
 0x136   : > { %v3744_v39 = vpop.permute.xlu1 %1010  ;;  %v3746_v17 = vpop.permute.xlu0 %1008 }
 0x137   : > { %4799 = vst [vmem:[#allocation75_spill] sm:$0xff] %v3744_v39  ;;  %4800 = vst [vmem:[#allocation76_spill] sm:$0xff] %v3746_v17 }
 0x138   : > { %1707 = vrot.lane.b32.xlu1 %v3739_v27, %s3088_s24  ;;  %1705 = vrot.lane.b32.xlu0 %v3742_v23, %s3088_s24 }
 0x13a   : > { %v3758_v29 = vpop.permute.xlu1 %1018  ;;  %v3760_v35 = vpop.permute.xlu0 %1016 }
 0x13b   : > { %4803 = vst [vmem:[#allocation79_spill] sm:$0xff] %v3758_v29  ;;  %4804 = vst [vmem:[#allocation80_spill] sm:$0xff] %v3760_v35 }
 0x13c   : > { %1711 = vrot.lane.b32.xlu1 %v3753_v22, %s3088_s24  ;;  %1709 = vrot.lane.b32.xlu0 %v3756_v38, %s3088_s24 }
 0x13e   : > { %v3766_v17 = vpop.permute.xlu1 %1022  ;;  %v3768_v39 = vpop.permute.xlu0 %1020 }
 0x13f   : > { %4805 = vst [vmem:[#allocation81_spill] sm:$0xff] %v3766_v17  ;;  %4806 = vst [vmem:[#allocation82_spill] sm:$0xff] %v3768_v39 }
 0x140   : > { %1719 = vrot.lane.b32.xlu1 %v3739_v27, %s3089_s18  ;;  %1717 = vrot.lane.b32.xlu0 %v3742_v23, %s3089_s18 }
 0x142   : > { %v3774_v29 = vpop.permute.xlu1 %1030  ;;  %v3776_v35 = vpop.permute.xlu0 %1028 }
 0x143   : > { %4807 = vst [vmem:[#allocation83_spill] sm:$0xff] %v3774_v29  ;;  %4808 = vst [vmem:[#allocation84_spill] sm:$0xff] %v3776_v35  ;;  %v3799_v29 = vld [vmem:[%s3208_s23 + $0x34] sm:$0x1] }
 0x144   : > { %1723 = vrot.lane.b32.xlu1 %v3753_v22, %s3089_s18  ;;  %1721 = vrot.lane.b32.xlu0 %v3756_v38, %s3089_s18  ;;  %4813 = vst [vmem:[#allocation89_spill] sm:$0xff] %v3799_v29 }
 0x146   : > { %v3782_v39 = vpop.permute.xlu1 %1034  ;;  %v3784_v17 = vpop.permute.xlu0 %1032 }
 0x147   : > { %4809 = vst [vmem:[#allocation85_spill] sm:$0xff] %v3782_v39  ;;  %4810 = vst [vmem:[#allocation86_spill] sm:$0xff] %v3784_v17  ;;  %v3802_v39 = vld [vmem:[%s3208_s23 + $0x30] sm:$0x1] }
 0x148   : > { %1731 = vrot.lane.b32.xlu1 %v3739_v27, %s3090_s25  ;;  %1729 = vrot.lane.b32.xlu0 %v3742_v23, %s3090_s25  ;;  %4814 = vst [vmem:[#allocation90_spill] sm:$0xff] %v3802_v39  ;;  %v3813_v23 = vld [vmem:[%s3208_s23 + $0x3c] sm:$0x1] }
 0x149   : > { %4817 = vst [vmem:[#allocation93_spill] sm:$0xff] %v3813_v23 }
 0x14a   : > { %v3790_v20 = vpop.permute.xlu1 %1146  ;;  %v3792_v35 = vpop.permute.xlu0 %1144 }
 0x14b   : > { %4811 = vst [vmem:[#allocation87_spill] sm:$0xff] %v3790_v20  ;;  %4812 = vst [vmem:[#allocation88_spill] sm:$0xff] %v3792_v35 }
 0x14c   : > { %1735 = vrot.lane.b32.xlu1 %v3753_v22, %s3090_s25  ;;  %1733 = vrot.lane.b32.xlu0 %v3756_v38, %s3090_s25  ;;  %v3816_v22 = vld [vmem:[%s3208_s23 + $0x38] sm:$0x1] }
 0x14d   : > { %4818 = vst [vmem:[#allocation94_spill] sm:$0xff] %v3816_v22 }
 0x14e   : > { %v3804_v17 = vpop.permute.xlu1 %1150  ;;  %v3806_v27 = vpop.permute.xlu0 %1148 }
 0x14f   : > { %4815 = vst [vmem:[#allocation91_spill] sm:$0xff] %v3804_v17  ;;  %4816 = vst [vmem:[#allocation92_spill] sm:$0xff] %v3806_v27 }
 0x150   : > { %1848 = vrot.lane.b32.xlu1 %v3799_v29, %s3088_s24  ;;  %1846 = vrot.lane.b32.xlu0 %v3802_v39, %s3088_s24 }
 0x152   : > { %v3818_v35 = vpop.permute.xlu1 %1158  ;;  %v3820_v38 = vpop.permute.xlu0 %1156 }
 0x153   : > { %4819 = vst [vmem:[#allocation95_spill] sm:$0xff] %v3818_v35  ;;  %4820 = vst [vmem:[#allocation96_spill] sm:$0xff] %v3820_v38 }
 0x154   : > { %1852 = vrot.lane.b32.xlu1 %v3813_v23, %s3088_s24  ;;  %1850 = vrot.lane.b32.xlu0 %v3816_v22, %s3088_s24 }
 0x156   : > { %v3826_v27 = vpop.permute.xlu1 %1162  ;;  %v3828_v17 = vpop.permute.xlu0 %1160 }
 0x157   : > { %4821 = vst [vmem:[#allocation97_spill] sm:$0xff] %v3826_v27  ;;  %4822 = vst [vmem:[#allocation98_spill] sm:$0xff] %v3828_v17 }
 0x158   : > { %1860 = vrot.lane.b32.xlu1 %v3799_v29, %s3089_s18  ;;  %1858 = vrot.lane.b32.xlu0 %v3802_v39, %s3089_s18 }
 0x15a   : > { %v3834_v35 = vpop.permute.xlu1 %1170  ;;  %v3836_v38 = vpop.permute.xlu0 %1168 }
 0x15b   : > { %4823 = vst [vmem:[#allocation99_spill] sm:$0xff] %v3834_v35  ;;  %4824 = vst [vmem:[#allocation100_spill] sm:$0xff] %v3836_v38  ;;  %v3859_v35 = vld [vmem:[%s3208_s23 + $0x35] sm:$0x1] }
 0x15c   : > { %1864 = vrot.lane.b32.xlu1 %v3813_v23, %s3089_s18  ;;  %1862 = vrot.lane.b32.xlu0 %v3816_v22, %s3089_s18  ;;  %4829 = vst [vmem:[#allocation105_spill] sm:$0xff] %v3859_v35 }
 0x15e   : > { %v3842_v17 = vpop.permute.xlu1 %1174  ;;  %v3844_v27 = vpop.permute.xlu0 %1172 }
 0x15f   : > { %4825 = vst [vmem:[#allocation101_spill] sm:$0xff] %v3842_v17  ;;  %4826 = vst [vmem:[#allocation102_spill] sm:$0xff] %v3844_v27  ;;  %v3862_v17 = vld [vmem:[%s3208_s23 + $0x31] sm:$0x1] }
 0x160   : > { %1872 = vrot.lane.b32.xlu1 %v3799_v29, %s3090_s25  ;;  %1870 = vrot.lane.b32.xlu0 %v3802_v39, %s3090_s25  ;;  %4830 = vst [vmem:[#allocation106_spill] sm:$0xff] %v3862_v17  ;;  %v3873_v39 = vld [vmem:[%s3208_s23 + $0x3d] sm:$0x1] }
 0x161   : > { %4833 = vst [vmem:[#allocation109_spill] sm:$0xff] %v3873_v39 }
 0x162   : > { %v3850_v20 = vpop.permute.xlu1 %1287  ;;  %v3852_v38 = vpop.permute.xlu0 %1285 }
 0x163   : > { %4827 = vst [vmem:[#allocation103_spill] sm:$0xff] %v3850_v20  ;;  %4828 = vst [vmem:[#allocation104_spill] sm:$0xff] %v3852_v38 }
 0x164   : > { %1876 = vrot.lane.b32.xlu1 %v3813_v23, %s3090_s25  ;;  %1874 = vrot.lane.b32.xlu0 %v3816_v22, %s3090_s25  ;;  %v3876_v23 = vld [vmem:[%s3208_s23 + $0x39] sm:$0x1] }
 0x165   : > { %4834 = vst [vmem:[#allocation110_spill] sm:$0xff] %v3876_v23 }
 0x166   : > { %v3864_v27 = vpop.permute.xlu1 %1291  ;;  %v3866_v29 = vpop.permute.xlu0 %1289 }
 0x167   : > { %4831 = vst [vmem:[#allocation107_spill] sm:$0xff] %v3864_v27  ;;  %4832 = vst [vmem:[#allocation108_spill] sm:$0xff] %v3866_v29 }
 0x168   : > { %1988 = vrot.lane.b32.xlu1 %v3859_v35, %s3088_s24  ;;  %1986 = vrot.lane.b32.xlu0 %v3862_v17, %s3088_s24 }
 0x16a   : > { %v3878_v38 = vpop.permute.xlu1 %1299  ;;  %v3880_v22 = vpop.permute.xlu0 %1297 }
 0x16b   : > { %4835 = vst [vmem:[#allocation111_spill] sm:$0xff] %v3878_v38  ;;  %4836 = vst [vmem:[#allocation112_spill] sm:$0xff] %v3880_v22 }
 0x16c   : > { %1992 = vrot.lane.b32.xlu1 %v3873_v39, %s3088_s24  ;;  %1990 = vrot.lane.b32.xlu0 %v3876_v23, %s3088_s24 }
 0x16e   : > { %v3886_v29 = vpop.permute.xlu1 %1303  ;;  %v3888_v27 = vpop.permute.xlu0 %1301 }
 0x16f   : > { %4837 = vst [vmem:[#allocation113_spill] sm:$0xff] %v3886_v29  ;;  %4838 = vst [vmem:[#allocation114_spill] sm:$0xff] %v3888_v27 }
 0x170   : > { %2000 = vrot.lane.b32.xlu1 %v3859_v35, %s3089_s18  ;;  %1998 = vrot.lane.b32.xlu0 %v3862_v17, %s3089_s18 }
 0x172   : > { %v3894_v38 = vpop.permute.xlu1 %1311  ;;  %v3896_v22 = vpop.permute.xlu0 %1309 }
 0x173   : > { %4839 = vst [vmem:[#allocation115_spill] sm:$0xff] %v3894_v38  ;;  %4840 = vst [vmem:[#allocation116_spill] sm:$0xff] %v3896_v22  ;;  %v3919_v38 = vld [vmem:[%s3208_s23 + $0x36] sm:$0x1] }
 0x174   : > { %2004 = vrot.lane.b32.xlu1 %v3873_v39, %s3089_s18  ;;  %2002 = vrot.lane.b32.xlu0 %v3876_v23, %s3089_s18  ;;  %4845 = vst [vmem:[#allocation121_spill] sm:$0xff] %v3919_v38 }
 0x176   : > { %v3902_v27 = vpop.permute.xlu1 %1315  ;;  %v3904_v29 = vpop.permute.xlu0 %1313 }
 0x177   : > { %4841 = vst [vmem:[#allocation117_spill] sm:$0xff] %v3902_v27  ;;  %4842 = vst [vmem:[#allocation118_spill] sm:$0xff] %v3904_v29  ;;  %v3922_v27 = vld [vmem:[%s3208_s23 + $0x32] sm:$0x1] }
 0x178   : > { %2012 = vrot.lane.b32.xlu1 %v3859_v35, %s3090_s25  ;;  %2010 = vrot.lane.b32.xlu0 %v3862_v17, %s3090_s25  ;;  %4846 = vst [vmem:[#allocation122_spill] sm:$0xff] %v3922_v27  ;;  %v3933_v17 = vld [vmem:[%s3208_s23 + $0x3e] sm:$0x1] }
 0x179   : > { %4849 = vst [vmem:[#allocation125_spill] sm:$0xff] %v3933_v17 }
 0x17a   : > { %v3910_v20 = vpop.permute.xlu1 %1427  ;;  %v3912_v22 = vpop.permute.xlu0 %1425 }
 0x17b   : > { %4843 = vst [vmem:[#allocation119_spill] sm:$0xff] %v3910_v20  ;;  %4844 = vst [vmem:[#allocation120_spill] sm:$0xff] %v3912_v22 }
 0x17c   : > { %2016 = vrot.lane.b32.xlu1 %v3873_v39, %s3090_s25  ;;  %2014 = vrot.lane.b32.xlu0 %v3876_v23, %s3090_s25  ;;  %v3936_v39 = vld [vmem:[%s3208_s23 + $0x3a] sm:$0x1] }
 0x17d   : > { %4850 = vst [vmem:[#allocation126_spill] sm:$0xff] %v3936_v39 }
 0x17e   : > { %v3924_v29 = vpop.permute.xlu1 %1431  ;;  %v3926_v35 = vpop.permute.xlu0 %1429 }
 0x17f   : > { %4847 = vst [vmem:[#allocation123_spill] sm:$0xff] %v3924_v29  ;;  %4848 = vst [vmem:[#allocation124_spill] sm:$0xff] %v3926_v35 }
 0x180   : > { %2128 = vrot.lane.b32.xlu1 %v3919_v38, %s3088_s24  ;;  %2126 = vrot.lane.b32.xlu0 %v3922_v27, %s3088_s24 }
 0x182   : > { %v3938_v22 = vpop.permute.xlu1 %1439  ;;  %v3940_v23 = vpop.permute.xlu0 %1437 }
 0x183   : > { %4851 = vst [vmem:[#allocation127_spill] sm:$0xff] %v3938_v22  ;;  %4852 = vst [vmem:[#allocation128_spill] sm:$0xff] %v3940_v23 }
 0x184   : > { %2132 = vrot.lane.b32.xlu1 %v3933_v17, %s3088_s24  ;;  %2130 = vrot.lane.b32.xlu0 %v3936_v39, %s3088_s24 }
 0x186   : > { %v3946_v35 = vpop.permute.xlu1 %1443  ;;  %v3948_v29 = vpop.permute.xlu0 %1441 }
 0x187   : > { %4853 = vst [vmem:[#allocation129_spill] sm:$0xff] %v3946_v35  ;;  %4854 = vst [vmem:[#allocation130_spill] sm:$0xff] %v3948_v29 }
 0x188   : > { %2140 = vrot.lane.b32.xlu1 %v3919_v38, %s3089_s18  ;;  %2138 = vrot.lane.b32.xlu0 %v3922_v27, %s3089_s18 }
 0x18a   : > { %v3954_v22 = vpop.permute.xlu1 %1451  ;;  %v3956_v23 = vpop.permute.xlu0 %1449 }
 0x18b   : > { %4855 = vst [vmem:[#allocation131_spill] sm:$0xff] %v3954_v22  ;;  %4856 = vst [vmem:[#allocation132_spill] sm:$0xff] %v3956_v23  ;;  %v3979_v22 = vld [vmem:[%s3208_s23 + $0x37] sm:$0x1] }
 0x18c   : > { %2144 = vrot.lane.b32.xlu1 %v3933_v17, %s3089_s18  ;;  %2142 = vrot.lane.b32.xlu0 %v3936_v39, %s3089_s18 }
 0x18e   : > { %v3962_v29 = vpop.permute.xlu1 %1455  ;;  %v3964_v35 = vpop.permute.xlu0 %1453 }
 0x18f   : > { %4857 = vst [vmem:[#allocation133_spill] sm:$0xff] %v3962_v29  ;;  %4858 = vst [vmem:[#allocation134_spill] sm:$0xff] %v3964_v35  ;;  %v3982_v29 = vld [vmem:[%s3208_s23 + $0x33] sm:$0x1] }
 0x190   : > { %2152 = vrot.lane.b32.xlu1 %v3919_v38, %s3090_s25  ;;  %2150 = vrot.lane.b32.xlu0 %v3922_v27, %s3090_s25  ;;  %4861 = vst [vmem:[#allocation137_spill] sm:$0xff] %v3982_v29  ;;  %v3993_v27 = vld [vmem:[%s3208_s23 + $0x3f] sm:$0x1] }
 0x191   : > { %4864 = vst [vmem:[#allocation140_spill] sm:$0xff] %v3993_v27 }
 0x192   : > { %v3970_v20 = vpop.permute.xlu1 %1567  ;;  %v3972_v23 = vpop.permute.xlu0 %1565 }
 0x193   : > { %4859 = vst [vmem:[#allocation135_spill] sm:$0xff] %v3970_v20  ;;  %4860 = vst [vmem:[#allocation136_spill] sm:$0xff] %v3972_v23  ;;  %v3091_v20 = vmov 1983009808  }
 0x194   : > { %2156 = vrot.lane.b32.xlu1 %v3933_v17, %s3090_s25  ;;  %2154 = vrot.lane.b32.xlu0 %v3936_v39, %s3090_s25  ;;  %v3996_v17 = vld [vmem:[%s3208_s23 + $0x3b] sm:$0x1]  ;;  %v201_v21 = vunpack.c.l.s4 %v3091_v20  ;;  %v371_v20 = vcombine.low %v3430_v36, %v3474_v48 }
 0x195   : > { %4865 = vst [vmem:[#allocation141_spill] sm:$0xff] %v3996_v17 }
 0x196   : > { %v3984_v35 = vpop.permute.xlu1 %1571  ;;  %v3986_v38 = vpop.permute.xlu0 %1569  ;;  %v202_v26 = vunpack.c.0.s8 %v201_v21 }
 0x197   : > { %4862 = vst [vmem:[#allocation138_spill] sm:$0xff] %v3984_v35  ;;  %4863 = vst [vmem:[#allocation139_spill] sm:$0xff] %v3986_v38 }
 0x198   : > { %2268 = vrot.lane.b32.xlu1 %v3979_v22, %s3088_s24  ;;  %2266 = vrot.lane.b32.xlu0 %v3982_v29, %s3088_s24  ;;  %v4022_v21 = vsub.s32 %v202_v26, %v204_v42  ;;  %v419_v26 = vcombine.low %v3444_v40, %v3482_v50 }
 0x19a   : > { %v3998_v23 = vpop.permute.xlu1 %1579  ;;  %v4000_v39 = vpop.permute.xlu0 %1577  ;;  %v378_v36 = vrot.slane %v371_v20, %v4022_v21  ;;  %v370_v45 = vrot.slane %v363_v16, %v4022_v21  ;;  %v346_v48 = vrot.slane %v339_v43, %v4022_v21  ;;  %v511_v43 = vcombine.low %v3490_v52, %v3534_v0 }
 0x19b   : > { %4866 = vst [vmem:[#allocation142_spill] sm:$0xff] %v3998_v23  ;;  %4867 = vst [vmem:[#allocation143_spill] sm:$0xff] %v4000_v39  ;;  %v347_v39 = vcombine.low %v3432_v37, %v3476_v49  ;;  %v411_v49 = vcombine.low %v3241_v6, %v3466_v46  ;;  %v487_v6 = vcombine.low %v3492_v53, %v3536_v1 }
 0x19c   : > { %2272 = vrot.lane.b32.xlu1 %v3993_v27, %s3088_s24  ;;  %2270 = vrot.lane.b32.xlu0 %v3996_v17, %s3088_s24  ;;  %v379_v40 = vcombine.low %v370_v45, %v378_v36  ;;  %v503_v20 = vcombine.low %v3267_v8, %v3518_v60  ;;  %v479_v36 = vcombine.low %v3270_v9, %v3520_v61  ;;  %s3107_s24 = smov 60  }
 0x19d   : > { %v354_v37 = vrot.slane %v347_v39, %v4022_v21  ;;  %v387_v39 = vcombine.low %v3244_v7, %v3468_v47  ;;  %v418_v47 = vrot.slane %v411_v49, %v4022_v21  ;;  %v494_v8 = vrot.slane %v487_v6, %v4022_v21 }
 0x19e   : > { %v4006_v38 = vpop.permute.xlu1 %1583  ;;  %v4008_v35 = vpop.permute.xlu0 %1581  ;;  %v535_v9 = vcombine.low %v3506_v57, %v3544_v3  ;;  %v527_v45 = vcombine.low %v3280_v11, %v3528_v63  ;;  %v627_v57 = vcombine.low %v3552_v30, %v3596_v58  ;;  %v619_v30 = vcombine.low %v3306_v13, %v3580_v25 }
 0x19f   : > { %4868 = vst [vmem:[#allocation144_spill] sm:$0xff] %v4006_v38  ;;  %4869 = vst [vmem:[#allocation145_spill] sm:$0xff] %v4008_v35  ;;  %v3092_v38 = vmov 1934713408  }
 0x1a0   : > { %2280 = vrot.lane.b32.xlu1 %v3979_v22, %s3089_s18  ;;  %2278 = vrot.lane.b32.xlu0 %v3982_v29, %s3089_s18  ;;  %v217_v35 = vunpack.c.l.s4 %v3092_v38  ;;  %v395_v38 = vcombine.low %v3446_v41, %v3484_v51  ;;  %v355_v41 = vcombine.low %v346_v48, %v354_v37  ;;  %v394_v51 = vrot.slane %v387_v39, %v4022_v21 }
 0x1a1   : > { %v518_v37 = vrot.slane %v511_v43, %v4022_v21  ;;  %v542_v11 = vrot.slane %v535_v9, %v4022_v21  ;;  %v4874_v9 = vld [vmem:[#allocation8_spill] sm:$0xff] }
 0x1a2   : > { %v4018_v23 = vpop.permute.xlu1 %1591  ;;  %v4020_v18 = vpop.permute.xlu0 %1589  ;;  %v218_v5 = vunpack.c.0.s8 %v217_v35  ;;  %v426_v35 = vrot.slane %v419_v26, %v4022_v21  ;;  %v402_v50 = vrot.slane %v395_v38, %v4022_v21  ;;  %v510_v26 = vrot.slane %v503_v20, %v4022_v21 }
 0x1a3   : > { %v486_v38 = vrot.slane %v479_v36, %v4022_v21  ;;  %v4870_v36 = vld [vmem:[#allocation40_spill] sm:$0xff] }
 0x1a4   : > { %2284 = vrot.lane.b32.xlu1 %v3993_v27, %s3089_s18  ;;  %2282 = vrot.lane.b32.xlu0 %v3996_v17, %s3089_s18  ;;  %v4066_v16 = vsub.s32 %v218_v5, %v204_v42  ;;  %v427_v52 = vcombine.low %v418_v47, %v426_v35  ;;  %v403_v53 = vcombine.low %v394_v51, %v402_v50 }
 0x1a5   : > { %v559_v42 = vcombine.low %v3504_v56, %v3542_v2  ;;  %v551_v5 = vcombine.low %v3277_v10, %v3526_v62  ;;  %v651_v56 = vcombine.low %v3550_v31, %v3594_v59  ;;  %v519_v48 = vcombine.low %v510_v26, %v518_v37 }
 0x1a6   : > { %v4038_v4 = vpop.permute.xlu1 %1595  ;;  %v4040_v44 = vpop.permute.xlu0 %1593  ;;  %v386_v0 = vrot.slane %v379_v40, %v4066_v16  ;;  %v362_v1 = vrot.slane %v355_v41, %v4066_v16  ;;  %v434_v2 = vrot.slane %v427_v52, %v4066_v16  ;;  %v410_v3 = vrot.slane %v403_v53, %v4066_v16  ;;  %v4871_v53 = vld [vmem:[#allocation52_spill] sm:$0xff] }
 0x1a7   : > { %v495_v10 = vcombine.low %v486_v38, %v494_v8  ;;  %v566_v62 = vrot.slane %v559_v42, %v4022_v21  ;;  %v643_v31 = vcombine.low %v3303_v12, %v3578_v33  ;;  %v558_v58 = vrot.slane %v551_v5, %v4022_v21  ;;  %v4873_v42 = vld [vmem:[#allocation48_spill] sm:$0xff]  ;;  %v4875_v38 = vld [vmem:[#allocation49_spill] sm:$0xff] }
 0x1a8   : > { %2292 = vrot.lane.b32.xlu1 %v3979_v22, %s3090_s25  ;;  %2290 = vrot.lane.b32.xlu0 %v3982_v29, %s3090_s25  ;;  %v534_v59 = vrot.slane %v527_v45, %v4022_v21  ;;  %v658_v39 = vrot.slane %v651_v56, %v4022_v21  ;;  %v634_v40 = vrot.slane %v627_v57, %v4022_v21 }
 0x1a9   : > { %v699_v41 = vcombine.low %v3564_v24, %v3602_v55  ;;  %v675_v12 = vcombine.low %v3566_v34, %v3604_v54  ;;  %v567_v33 = vcombine.low %v558_v58, %v566_v62  ;;  %v526_v50 = vrot.slane %v519_v48, %v4066_v16  ;;  %v4878_v62 = vld [vmem:[#allocation44_spill] sm:$0xff] }
 0x1aa   : > { %v4058_v46 = vpop.permute.xlu1 %1707  ;;  %v4060_v7 = vpop.permute.xlu0 %1705  ;;  %v543_v13 = vcombine.low %v534_v59, %v542_v11  ;;  %v502_v43 = vrot.slane %v495_v10, %v4066_v16  ;;  %v650_v6 = vrot.slane %v643_v31, %v4022_v21  ;;  %v626_v47 = vrot.slane %v619_v30, %v4022_v21  ;;  %v4877_v10 = vld [vmem:[#allocation53_spill] sm:$0xff]  ;;  %v4879_v31 = vld [vmem:[#allocation54_spill] sm:$0xff] }
 0x1ab   : > { %v691_v24 = vcombine.low %v3313_v14, %v3586_v32  ;;  %v667_v34 = vcombine.low %v3316_v15, %v3588_v28  ;;  %v706_v51 = vrot.slane %v699_v41, %v4022_v21  ;;  %v682_v20 = vrot.slane %v675_v12, %v4022_v21  ;;  %v4880_v30 = vld [vmem:[#allocation45_spill] sm:$0xff]  ;;  %v4881_v12 = vld [vmem:[#allocation50_spill] sm:$0xff] }
 0x1ac   : > { %2296 = vrot.lane.b32.xlu1 %v3993_v27, %s3090_s25  ;;  %2294 = vrot.lane.b32.xlu0 %v3996_v17, %s3090_s25  ;;  %v659_v54 = vcombine.low %v650_v6, %v658_v39  ;;  %v635_v55 = vcombine.low %v626_v47, %v634_v40  ;;  %v792_v52 = vcombine.low %v4870_v36, %v3654_v19  ;;  %v4876_v19 = vld [vmem:[#allocation9_spill] sm:$0xff]  ;;  %v4885_v47 = vld [vmem:[#allocation67_spill] sm:$0xff] }
 0x1ad   : > { %v574_v15 = vrot.slane %v567_v33, %v4066_v16  ;;  %v550_v28 = vrot.slane %v543_v13, %v4066_v16  ;;  %v698_v32 = vrot.slane %v691_v24, %v4022_v21  ;;  %v674_v8 = vrot.slane %v667_v34, %v4022_v21  ;;  %v4882_v33 = vld [vmem:[#allocation10_spill] sm:$0xff]  ;;  %v4886_v24 = vld [vmem:[#allocation55_spill] sm:$0xff] }
 0x1ae   : > { %v4082_v60 = vpop.permute.xlu1 %1711  ;;  %v4084_v61 = vpop.permute.xlu0 %1709  ;;  %v784_v26 = vcombine.low %v4874_v9, %v4873_v42  ;;  %v760_v5 = vcombine.low %v4876_v19, %v4875_v38  ;;  %v666_v57 = vrot.slane %v659_v54, %v4066_v16  ;;  %v840_v11 = vcombine.low %v4878_v62, %v4877_v10  ;;  %v4887_v54 = vld [vmem:[#allocation68_spill] sm:$0xff]  ;;  %v4956_v17 = vld [vmem:[#allocation43_spill] sm:$0xff] }
 0x1af   : > { %v707_v45 = vcombine.low %v698_v32, %v706_v51  ;;  %v683_v56 = vcombine.low %v674_v8, %v682_v20  ;;  %v816_v58 = vcombine.low %v4880_v30, %v4879_v31  ;;  %v832_v13 = vcombine.low %v4882_v33, %v4881_v12  ;;  %v4889_v32 = vld [vmem:[#allocation63_spill] sm:$0xff]  ;;  %v4890_v8 = vld [vmem:[#allocation14_spill] sm:$0xff]  ;;  %v4891_v9 = vld [vmem:[#allocation64_spill] sm:$0xff] }
 0x1b0   : > { %2404 = vrot.lane.b32.xlu1 %v386_v0, %s3093_s26  ;;  %2402 = vrot.lane.b32.xlu0 %v362_v1, %s3093_s26  ;;  %v4872_v0 = vld [vmem:[#allocation41_spill] sm:$0xff]  ;;  %v791_v40 = vrot.slane %v784_v26, %v4022_v21  ;;  %v767_v41 = vrot.slane %v760_v5, %v4022_v21  ;;  %v932_v34 = vcombine.low %v4886_v24, %v4885_v47  ;;  %v4892_v26 = vld [vmem:[#allocation15_spill] sm:$0xff]  ;;  %v4896_v10 = vld [vmem:[#allocation60_spill] sm:$0xff] }
 0x1b1   : > { %v768_v1 = vcombine.low %v4872_v0, %v4871_v53  ;;  %v714_v20 = vrot.slane %v707_v45, %v4066_v16  ;;  %v690_v36 = vrot.slane %v683_v56, %v4066_v16  ;;  %v847_v0 = vrot.slane %v840_v11, %v4022_v21  ;;  %v4900_v47 = vld [vmem:[#allocation19_spill] sm:$0xff] }
 0x1b2   : > { %v4102_v63 = vpop.permute.xlu1 %1719  ;;  %v4104_v49 = vpop.permute.xlu0 %1717  ;;  %v924_v42 = vcombine.low %v4890_v8, %v4889_v32  ;;  %v900_v38 = vcombine.low %v4892_v26, %v4891_v9  ;;  %v839_v19 = vrot.slane %v832_v13, %v4022_v21  ;;  %v939_v45 = vrot.slane %v932_v34, %v4022_v21  ;;  %v4897_v13 = vld [vmem:[#allocation65_spill] sm:$0xff] }
 0x1b3   : > { %v775_v48 = vrot.slane %v768_v1, %v4022_v21  ;;  %v823_v1 = vrot.slane %v816_v58, %v4022_v21 }
 0x1b4   : > { %2408 = vrot.lane.b32.xlu1 %v434_v2, %s3093_s26  ;;  %2406 = vrot.lane.b32.xlu0 %v410_v3, %s3093_s26  ;;  %v642_v2 = vrot.slane %v635_v55, %v4066_v16  ;;  %v799_v3 = vrot.slane %v792_v52, %v4022_v21  ;;  %v4888_v55 = vld [vmem:[#allocation56_spill] sm:$0xff]  ;;  %v848_v11 = vcombine.low %v839_v19, %v847_v0  ;;  %v4905_v19 = vld [vmem:[#allocation79_spill] sm:$0xff] }
 0x1b5   : > { %v908_v51 = vcombine.low %v4888_v55, %v4887_v54  ;;  %v776_v53 = vcombine.low %v767_v41, %v775_v48  ;;  %v4895_v48 = vld [vmem:[#allocation70_spill] sm:$0xff]  ;;  %v931_v12 = vrot.slane %v924_v42, %v4022_v21  ;;  %v907_v33 = vrot.slane %v900_v38, %v4022_v21  ;;  %v4904_v0 = vld [vmem:[#allocation72_spill] sm:$0xff] }
 0x1b6   : > { %v4120_v25 = vpop.permute.xlu1 %1723  ;;  %v4122_v35 = vpop.permute.xlu0 %1721  ;;  %v800_v52 = vcombine.low %v791_v40, %v799_v3  ;;  %v956_v62 = vcombine.low %v4896_v10, %v4895_v48  ;;  %v855_v42 = vrot.slane %v848_v11, %v4066_v16 }
 0x1b7   : > { %v915_v56 = vrot.slane %v908_v51, %v4022_v21  ;;  %v783_v41 = vrot.slane %v776_v53, %v4066_v16  ;;  %v940_v34 = vcombine.low %v931_v12, %v939_v45  ;;  %v4903_v53 = vld [vmem:[#allocation84_spill] sm:$0xff] }
 0x1b8   : > { %2420 = vrot.lane.b32.xlu1 %v526_v50, %s3094_s27  ;;  %2418 = vrot.lane.b32.xlu0 %v502_v43, %s3094_s27  ;;  %v4883_v50 = vld [vmem:[#allocation51_spill] sm:$0xff]  ;;  %v807_v40 = vrot.slane %v800_v52, %v4066_v16  ;;  %v963_v51 = vrot.slane %v956_v62, %v4022_v21 }
 0x1b9   : > { %v4884_v43 = vld [vmem:[#allocation11_spill] sm:$0xff]  ;;  %v916_v54 = vcombine.low %v907_v33, %v915_v56  ;;  %v4907_v56 = vld [vmem:[#allocation80_spill] sm:$0xff]  ;;  %v947_v10 = vrot.slane %v940_v34, %v4066_v16  ;;  %v4911_v33 = vld [vmem:[#allocation86_spill] sm:$0xff] }
 0x1ba   : > { %v4138_v37 = vpop.permute.xlu1 %1731  ;;  %v4140_v14 = vpop.permute.xlu0 %1729  ;;  %v808_v6 = vcombine.low %v4884_v43, %v4883_v50  ;;  %v4898_v50 = vld [vmem:[#allocation18_spill] sm:$0xff]  ;;  %v4913_v34 = vld [vmem:[#allocation81_spill] sm:$0xff] }
 0x1bb   : > { %v972_v43 = vcombine.low %v4898_v50, %v4897_v13  ;;  %v923_v62 = vrot.slane %v916_v54, %v4066_v16  ;;  %v4912_v13 = vld [vmem:[#allocation76_spill] sm:$0xff]  ;;  %v4914_v54 = vld [vmem:[#allocation30_spill] sm:$0xff] }
 0x1bc   : > { %2424 = vrot.lane.b32.xlu1 %v574_v15, %s3094_s27  ;;  %2422 = vrot.lane.b32.xlu0 %v550_v28, %s3094_s27  ;;  %v815_v5 = vrot.slane %v808_v6, %v4022_v21  ;;  %v4899_v6 = vld [vmem:[#allocation66_spill] sm:$0xff]  ;;  %v1096_v50 = vcombine.low %v4912_v13, %v4911_v33  ;;  %v4924_v33 = vld [vmem:[#allocation33_spill] sm:$0xff]  ;;  %s2885_s27 = sshll.u32 %s3075_s9, 8 }
 0x1bd   : > { %v948_v24 = vcombine.low %v4900_v47, %v4899_v6  ;;  %v979_v26 = vrot.slane %v972_v43, %v4022_v21 }
 0x1be   : > { %v4158_v59 = vpop.permute.xlu1 %1735  ;;  %v4160_v39 = vpop.permute.xlu0 %1733  ;;  %v824_v31 = vcombine.low %v815_v5, %v823_v1  ;;  %v1048_v1 = vcombine.low %v4904_v0, %v4903_v53  ;;  %v4906_v5 = vld [vmem:[#allocation28_spill] sm:$0xff]  ;;  %v4918_v53 = vld [vmem:[#allocation87_spill] sm:$0xff] }
 0x1bf   : > { %v955_v38 = vrot.slane %v948_v24, %v4022_v21  ;;  %v1064_v45 = vcombine.low %v4906_v5, %v4905_v19 }
 0x1c0   : > { %2436 = vrot.lane.b32.xlu1 %v666_v57, %s3095_s28  ;;  %2434 = vrot.lane.b32.xlu0 %v642_v2, %s3095_s28  ;;  %v4893_v57 = vld [vmem:[#allocation69_spill] sm:$0xff]  ;;  %v4894_v2 = vld [vmem:[#allocation59_spill] sm:$0xff]  ;;  %v831_v9 = vrot.slane %v824_v31, %v4066_v16  ;;  %v1055_v31 = vrot.slane %v1048_v1, %v4022_v21  ;;  %v4919_v1 = vld [vmem:[#allocation100_spill] sm:$0xff] }
 0x1c1   : > { %v980_v3 = vcombine.low %v4894_v2, %v4893_v57  ;;  %v4908_v57 = vld [vmem:[#allocation29_spill] sm:$0xff]  ;;  %v964_v48 = vcombine.low %v955_v38, %v963_v51  ;;  %v1071_v47 = vrot.slane %v1064_v45, %v4022_v21  ;;  %v4915_v51 = vld [vmem:[#allocation82_spill] sm:$0xff] }
 0x1c2   : > { %v4176_v15 = vpop.permute.xlu1 %1848  ;;  %v4178_v28 = vpop.permute.xlu0 %1846  ;;  %v1040_v2 = vcombine.low %v4908_v57, %v4907_v56  ;;  %v1103_v56 = vrot.slane %v1096_v50, %v4022_v21  ;;  %v4926_v50 = vld [vmem:[#allocation91_spill] sm:$0xff] }
 0x1c3   : > { %v987_v55 = vrot.slane %v980_v3, %v4022_v21  ;;  %v971_v38 = vrot.slane %v964_v48, %v4066_v16 }
 0x1c4   : > { %2440 = vrot.lane.b32.xlu1 %v714_v20, %s3095_s28  ;;  %2438 = vrot.lane.b32.xlu0 %v690_v36, %s3095_s28  ;;  %v4901_v20 = vld [vmem:[#allocation83_spill] sm:$0xff]  ;;  %v1047_v24 = vrot.slane %v1040_v2, %v4022_v21 }
 0x1c5   : > { %v4902_v36 = vld [vmem:[#allocation71_spill] sm:$0xff]  ;;  %v988_v3 = vcombine.low %v979_v26, %v987_v55  ;;  %v1112_v55 = vcombine.low %v4914_v54, %v4913_v34  ;;  %v4928_v34 = vld [vmem:[#allocation92_spill] sm:$0xff] }
 0x1c6   : > { %v4192_v30 = vpop.permute.xlu1 %1852  ;;  %v4194_v58 = vpop.permute.xlu0 %1850  ;;  %v1072_v52 = vcombine.low %v4902_v36, %v4901_v20  ;;  %v4916_v20 = vld [vmem:[#allocation31_spill] sm:$0xff]  ;;  %v1056_v5 = vcombine.low %v1047_v24, %v1055_v31  ;;  %v4927_v24 = vld [vmem:[#allocation102_spill] sm:$0xff] }
 0x1c7   : > { %v1088_v36 = vcombine.low %v4916_v20, %v4915_v51  ;;  %v995_v26 = vrot.slane %v988_v3, %v4066_v16  ;;  %v1119_v3 = vrot.slane %v1112_v55, %v4022_v21  ;;  %v1236_v54 = vcombine.low %v4928_v34, %v4927_v24 }
 0x1c8   : > { %2452 = vrot.lane.b32.xlu1 %v807_v40, %s3096_s29  ;;  %2450 = vrot.lane.b32.xlu0 %v783_v41, %s3096_s29  ;;  %v1079_v11 = vrot.slane %v1072_v52, %v4022_v21  ;;  %v4909_v40 = vld [vmem:[#allocation85_spill] sm:$0xff]  ;;  %v4910_v41 = vld [vmem:[#allocation75_spill] sm:$0xff] }
 0x1c9   : > { %v1120_v12 = vcombine.low %v4910_v41, %v4909_v40  ;;  %v4917_v52 = vld [vmem:[#allocation99_spill] sm:$0xff]  ;;  %v4923_v41 = vld [vmem:[#allocation96_spill] sm:$0xff]  ;;  %v1095_v48 = vrot.slane %v1088_v36, %v4022_v21  ;;  %v1063_v36 = vrot.slane %v1056_v5, %v4066_v16 }
 0x1ca   : > { %v4210_v32 = vpop.permute.xlu1 %1860  ;;  %v4212_v8 = vpop.permute.xlu0 %1858  ;;  %v1212_v0 = vcombine.low %v4918_v53, %v4917_v52  ;;  %v1080_v19 = vcombine.low %v1071_v47, %v1079_v11  ;;  %v1180_v13 = vcombine.low %v4924_v33, %v4923_v41  ;;  %v4933_v5 = vld [vmem:[#allocation115_spill] sm:$0xff] }
 0x1cb   : > { %v1127_v45 = vrot.slane %v1120_v12, %v4022_v21  ;;  %v4925_v12 = vld [vmem:[#allocation101_spill] sm:$0xff]  ;;  %v1104_v20 = vcombine.low %v1095_v48, %v1103_v56  ;;  %v4934_v33 = vld [vmem:[#allocation103_spill] sm:$0xff] }
 0x1cc   : > { %2456 = vrot.lane.b32.xlu1 %v855_v42, %s3096_s29  ;;  %2454 = vrot.lane.b32.xlu0 %v831_v9, %s3096_s29  ;;  %v4920_v42 = vld [vmem:[#allocation88_spill] sm:$0xff]  ;;  %v1219_v11 = vrot.slane %v1212_v0, %v4022_v21  ;;  %v1260_v47 = vcombine.low %v4926_v50, %v4925_v12  ;;  %v1087_v55 = vrot.slane %v1080_v19, %v4066_v16  ;;  %s4626_s29 = scalar_lea.hbm %s4679_s1, %s2885_s27 }
 0x1cd   : > { %v1188_v9 = vcombine.low %v4920_v42, %v4919_v1  ;;  %v1128_v51 = vcombine.low %v1119_v3, %v1127_v45  ;;  %v1187_v1 = vrot.slane %v1180_v13, %v4022_v21  ;;  %v4929_v42 = vld [vmem:[#allocation97_spill] sm:$0xff]  ;;  %v1243_v19 = vrot.slane %v1236_v54, %v4022_v21  ;;  %v4935_v3 = vld [vmem:[#allocation116_spill] sm:$0xff] }
 0x1ce   : > { %v4230_v43 = vpop.permute.xlu1 %1864  ;;  %v4232_v6 = vpop.permute.xlu0 %1862  ;;  %v1267_v41 = vrot.slane %v1260_v47, %v4022_v21  ;;  %v4936_v13 = vld [vmem:[#allocation104_spill] sm:$0xff]  ;;  %v1111_v34 = vrot.slane %v1104_v20, %v4066_v16  ;;  %v4937_v47 = vld [vmem:[#allocation111_spill] sm:$0xff] }
 0x1cf   : > { %v1195_v31 = vrot.slane %v1188_v9, %v4022_v21  ;;  %v4930_v9 = vld [vmem:[#allocation34_spill] sm:$0xff]  ;;  %v1329_v48 = vcombine.low %v4936_v13, %v4935_v3  ;;  %v1135_v24 = vrot.slane %v1128_v51, %v4066_v16  ;;  %v4938_v54 = vld [vmem:[#allocation36_spill] sm:$0xff] }
 0x1d0   : > { %2468 = vrot.lane.b32.xlu1 %v947_v10, %s3097_s30  ;;  %2466 = vrot.lane.b32.xlu0 %v923_v62, %s3097_s30  ;;  %v4921_v10 = vld [vmem:[#allocation95_spill] sm:$0xff]  ;;  %v4922_v62 = vld [vmem:[#allocation32_spill] sm:$0xff] }
 0x1d1   : > { %v1204_v40 = vcombine.low %v4922_v62, %v4921_v10  ;;  %v4932_v10 = vld [vmem:[#allocation35_spill] sm:$0xff]  ;;  %v1196_v56 = vcombine.low %v1187_v1, %v1195_v31  ;;  %v4944_v3 = vld [vmem:[#allocation108_spill] sm:$0xff] }
 0x1d2   : > { %v4248_v57 = vpop.permute.xlu1 %1872  ;;  %v4250_v2 = vpop.permute.xlu0 %1870 }
 0x1d3   : > { %v1211_v0 = vrot.slane %v1204_v40, %v4022_v21  ;;  %v1353_v40 = vcombine.low %v4934_v33, %v4933_v5  ;;  %v1203_v51 = vrot.slane %v1196_v56, %v4066_v16  ;;  %v4943_v33 = vld [vmem:[#allocation118_spill] sm:$0xff] }
 0x1d4   : > { %2472 = vrot.lane.b32.xlu1 %v995_v26, %s3097_s30  ;;  %2470 = vrot.lane.b32.xlu0 %v971_v38, %s3097_s30  ;;  %v1252_v26 = vcombine.low %v4930_v9, %v4929_v42  ;;  %v4931_v38 = vld [vmem:[#allocation98_spill] sm:$0xff]  ;;  %v1377_v13 = vcombine.low %v4944_v3, %v4943_v33  ;;  %s2719_s30 = scalar_lea.sflag [#allocation4], %s3204_s16 }
 0x1d5   : > { %v1228_v62 = vcombine.low %v4932_v10, %v4931_v38  ;;  %v1220_v45 = vcombine.low %v1211_v0, %v1219_v11  ;;  %v4940_v0 = vld [vmem:[#allocation37_spill] sm:$0xff]  ;;  %v1360_v20 = vrot.slane %v1353_v40, %v4022_v21  ;;  %v4946_v56 = vld [vmem:[#allocation38_spill] sm:$0xff] }
 0x1d6   : > { %v4264_v52 = vpop.permute.xlu1 %1876  ;;  %v4266_v53 = vpop.permute.xlu0 %1874  ;;  %v1259_v11 = vrot.slane %v1252_v26, %v4022_v21  ;;  %v1336_v26 = vrot.slane %v1329_v48, %v4022_v21  ;;  %v4941_v10 = vld [vmem:[#allocation117_spill] sm:$0xff]  ;;  %v4947_v40 = vld [vmem:[#allocation114_spill] sm:$0xff] }
 0x1d7   : > { %v1235_v31 = vrot.slane %v1228_v62, %v4022_v21  ;;  %v1227_v38 = vrot.slane %v1220_v45, %v4066_v16  ;;  %v4942_v62 = vld [vmem:[#allocation107_spill] sm:$0xff] }
 0x1d8   : > { %2484 = vrot.lane.b32.xlu1 %v1087_v55, %s3098_s2  ;;  %2482 = vrot.lane.b32.xlu0 %v1063_v36, %s3098_s2  ;;  %v1345_v55 = vcombine.low %v4938_v54, %v4937_v47  ;;  %v4939_v36 = vld [vmem:[#allocation112_spill] sm:$0xff]  ;;  %v1268_v42 = vcombine.low %v1259_v11, %v1267_v41  ;;  %v1401_v5 = vcombine.low %v4942_v62, %v4941_v10  ;;  %v4948_v11 = vld [vmem:[#allocation39_spill] sm:$0xff] }
 0x1d9   : > { %v1321_v1 = vcombine.low %v4940_v0, %v4939_v36  ;;  %v1244_v9 = vcombine.low %v1235_v31, %v1243_v19  ;;  %v4945_v19 = vld [vmem:[#allocation113_spill] sm:$0xff]  ;;  %v1369_v48 = vcombine.low %v4948_v11, %v4947_v40  ;;  %v4949_v31 = vld [vmem:[#allocation131_spill] sm:$0xff]  ;;  %v4951_v0 = vld [vmem:[#allocation132_spill] sm:$0xff] }
 0x1da   : > { %v4282_v12 = vpop.permute.xlu1 %1988  ;;  %v4284_v50 = vpop.permute.xlu0 %1986  ;;  %v1352_v41 = vrot.slane %v1345_v55, %v4022_v21  ;;  %v4950_v54 = vld [vmem:[#allocation119_spill] sm:$0xff]  ;;  %v4952_v10 = vld [vmem:[#allocation120_spill] sm:$0xff]  ;;  %v1275_v33 = vrot.slane %v1268_v42, %v4066_v16  ;;  %v4954_v11 = vld [vmem:[#allocation42_spill] sm:$0xff] }
 0x1db   : > { %v1328_v45 = vrot.slane %v1321_v1, %v4022_v21  ;;  %v1493_v36 = vcombine.low %v4950_v54, %v4949_v31  ;;  %v1469_v62 = vcombine.low %v4952_v10, %v4951_v0  ;;  %v1251_v55 = vrot.slane %v1244_v9, %v4066_v16  ;;  %v4955_v54 = vld [vmem:[#allocation128_spill] sm:$0xff] }
 0x1dc   : > { %2488 = vrot.lane.b32.xlu1 %v1135_v24, %s3098_s2  ;;  %2486 = vrot.lane.b32.xlu0 %v1111_v34, %s3098_s2  ;;  %v1393_v34 = vcombine.low %v4946_v56, %v4945_v19  ;;  %v1361_v1 = vcombine.low %v1352_v41, %v1360_v20  ;;  %v1408_v19 = vrot.slane %v1401_v5, %v4022_v21  ;;  %v4957_v5 = vld [vmem:[#allocation133_spill] sm:$0xff]  ;;  %v4960_v10 = vld [vmem:[#allocation124_spill] sm:$0xff] }
 0x1dd   : > { %v1337_v3 = vcombine.low %v1328_v45, %v1336_v26  ;;  %v1384_v56 = vrot.slane %v1377_v13, %v4022_v21  ;;  %v1461_v0 = vcombine.low %v4956_v17, %v4955_v54  ;;  %v1376_v9 = vrot.slane %v1369_v48, %v4022_v21  ;;  %v4958_v13 = vld [vmem:[#allocation123_spill] sm:$0xff]  ;;  %v4959_v45 = vld [vmem:[#allocation134_spill] sm:$0xff] }
 0x1de   : > { %v4302_v47 = vpop.permute.xlu1 %1992  ;;  %v4304_v24 = vpop.permute.xlu0 %1990  ;;  %v1400_v42 = vrot.slane %v1393_v34, %v4022_v21  ;;  %v1500_v20 = vrot.slane %v1493_v36, %v4022_v21  ;;  %v1476_v26 = vrot.slane %v1469_v62, %v4022_v21  ;;  %v1541_v41 = vcombine.low %v4958_v13, %v4957_v5  ;;  %v4963_v5 = vld [vmem:[#allocation130_spill] sm:$0xff]  ;;  %v4964_v13 = vld [vmem:[#allocation47_spill] sm:$0xff] }
 0x1df   : > { %v1517_v27 = vcombine.low %v4960_v10, %v4959_v45  ;;  %v1368_v34 = vrot.slane %v1361_v1, %v4066_v16  ;;  %v1344_v48 = vrot.slane %v1337_v3, %v4066_v16  ;;  %v1468_v62 = vrot.slane %v1461_v0, %v4022_v21  ;;  %v4965_v3 = vld [vmem:[#allocation135_spill] sm:$0xff]  ;;  %v4966_v0 = vld [vmem:[#allocation136_spill] sm:$0xff] }
 0x1e0   : > { %2500 = vrot.lane.b32.xlu1 %v1227_v38, %s3099_s3  ;;  %2498 = vrot.lane.b32.xlu0 %v1203_v51, %s3099_s3  ;;  %v4953_v51 = vld [vmem:[#allocation127_spill] sm:$0xff]  ;;  %v1509_v45 = vcombine.low %v4964_v13, %v4963_v5 }
 0x1e1   : > { %v1485_v31 = vcombine.low %v4954_v11, %v4953_v51  ;;  %v1409_v51 = vcombine.low %v1400_v42, %v1408_v19  ;;  %v1385_v11 = vcombine.low %v1376_v9, %v1384_v56  ;;  %v1477_v56 = vcombine.low %v1468_v62, %v1476_v26 }
 0x1e2   : > { %v4320_v40 = vpop.permute.xlu1 %2000  ;;  %v4322_v38 = vpop.permute.xlu0 %1998  ;;  %v1548_v42 = vrot.slane %v1541_v41, %v4022_v21  ;;  %v1524_v1 = vrot.slane %v1517_v27, %v4022_v21  ;;  %v1609_v9 = vcombine.low %v4966_v0, %v4020_v18  ;;  %v1516_v26 = vrot.slane %v1509_v45, %v4022_v21  ;;  %v4967_v41 = vld [vmem:[#allocation142_spill] sm:$0xff]  ;;  %v4968_v27 = vld [vmem:[#allocation57_spill] sm:$0xff]  ;;  %v4972_v0 = vld [vmem:[#allocation139_spill] sm:$0xff] }
 0x1e3   : > { %v1492_v36 = vrot.slane %v1485_v31, %v4022_v21  ;;  %v1633_v31 = vcombine.low %v4965_v3, %v4018_v23  ;;  %v4970_v23 = vld [vmem:[#allocation58_spill] sm:$0xff] }
 0x1e4   : > { %2504 = vrot.lane.b32.xlu1 %v1275_v33, %s3099_s3  ;;  %2502 = vrot.lane.b32.xlu0 %v1251_v55, %s3099_s3  ;;  %v4961_v33 = vld [vmem:[#allocation129_spill] sm:$0xff]  ;;  %v4962_v55 = vld [vmem:[#allocation46_spill] sm:$0xff]  ;;  %v1525_v5 = vcombine.low %v1516_v26, %v1524_v1  ;;  %v4973_v1 = vld [vmem:[#allocation144_spill] sm:$0xff]  ;;  %s3108_s3 = smov [#allocation5]  }
 0x1e5   : > { %v1533_v54 = vcombine.low %v4962_v55, %v4961_v33  ;;  %v1501_v19 = vcombine.low %v1492_v36, %v1500_v20  ;;  %v1416_v55 = vrot.slane %v1409_v51, %v4066_v16  ;;  %v4969_v36 = vld [vmem:[#allocation143_spill] sm:$0xff]  ;;  %v1484_v51 = vrot.slane %v1477_v56, %v4066_v16  ;;  %v4971_v45 = vld [vmem:[#allocation138_spill] sm:$0xff]  ;;  %v4974_v56 = vld [vmem:[#allocation61_spill] sm:$0xff] }
 0x1e6   : > { %v4336_v29 = vpop.permute.xlu1 %2004  ;;  %v4338_v17 = vpop.permute.xlu0 %2002  ;;  %v1601_v62 = vcombine.low %v4970_v23, %v4969_v36  ;;  %v1681_v3 = vcombine.low %v4971_v45, %v4038_v4  ;;  %v1773_v4 = vcombine.low %v4058_v46, %v4138_v37  ;;  %v4978_v37 = vld [vmem:[#allocation74_spill] sm:$0xff] }
 0x1e7   : > { %v1540_v20 = vrot.slane %v1533_v54, %v4022_v21  ;;  %v1508_v13 = vrot.slane %v1501_v19, %v4066_v16  ;;  %v1616_v54 = vrot.slane %v1609_v9, %v4022_v21 }
 0x1e8   : > { %2516 = vrot.lane.b32.xlu1 %v1368_v34, %s3100_s4  ;;  %2514 = vrot.lane.b32.xlu0 %v1344_v48, %s3100_s4  ;;  %v1392_v34 = vrot.slane %v1385_v11, %v4066_v16  ;;  %v1625_v48 = vcombine.low %v4968_v27, %v4967_v41  ;;  %v1640_v11 = vrot.slane %v1633_v31, %v4022_v21  ;;  %v4975_v31 = vld [vmem:[#allocation145_spill] sm:$0xff] }
 0x1e9   : > { %v1549_v18 = vcombine.low %v1540_v20, %v1548_v42  ;;  %v1657_v41 = vcombine.low %v4972_v0, %v4040_v44  ;;  %v1608_v19 = vrot.slane %v1601_v62, %v4022_v21  ;;  %v4976_v20 = vld [vmem:[#allocation62_spill] sm:$0xff]  ;;  %v1749_v44 = vcombine.low %v4060_v7, %v4140_v14 }
 0x1ea   : > { %v4354_v10 = vpop.permute.xlu1 %2012  ;;  %v4356_v33 = vpop.permute.xlu0 %2010  ;;  %v1632_v42 = vrot.slane %v1625_v48, %v4022_v21  ;;  %v1649_v9 = vcombine.low %v4976_v20, %v4975_v31  ;;  %v1532_v48 = vrot.slane %v1525_v5, %v4066_v16  ;;  %v1688_v62 = vrot.slane %v1681_v3, %v4022_v21  ;;  %v4979_v31 = vld [vmem:[#allocation77_spill] sm:$0xff] }
 0x1eb   : > { %v1556_v26 = vrot.slane %v1549_v18, %v4066_v16  ;;  %v1617_v23 = vcombine.low %v1608_v19, %v1616_v54  ;;  %v1664_v45 = vrot.slane %v1657_v41, %v4022_v21  ;;  %v1741_v7 = vcombine.low %v4978_v37, %v4104_v49 }
 0x1ec   : > { %2520 = vrot.lane.b32.xlu1 %v1416_v55, %s3100_s4  ;;  %2518 = vrot.lane.b32.xlu0 %v1392_v34, %s3100_s4  ;;  %v1673_v34 = vcombine.low %v4974_v56, %v4973_v1  ;;  %v1641_v36 = vcombine.low %v1632_v42, %v1640_v11  ;;  %v1656_v18 = vrot.slane %v1649_v9, %v4022_v21  ;;  %s3007_s4 = sshll.u32 %s3108_s3, 4  ;;  %s3008_s4 = int_to_ptr.vmem [resolvable:$false] %s3007_s4 }
 0x1ed   : > { %v1780_v5 = vrot.slane %v1773_v4, %v4022_v21  ;;  %v1756_v11 = vrot.slane %v1749_v44, %v4022_v21  ;;  %v1821_v54 = vcombine.low %v4082_v60, %v4158_v59  ;;  %v1797_v3 = vcombine.low %v4084_v61, %v4160_v39  ;;  %v4980_v59 = vld [vmem:[#allocation78_spill] sm:$0xff] }
 0x1ee   : > { %v4374_v27 = vpop.permute.xlu1 %2016  ;;  %v4376_v55 = vpop.permute.xlu0 %2014  ;;  %v1680_v14 = vrot.slane %v1673_v34, %v4022_v21  ;;  %v1665_v41 = vcombine.low %v1656_v18, %v1664_v45  ;;  %v1648_v19 = vrot.slane %v1641_v36, %v4066_v16  ;;  %v1624_v1 = vrot.slane %v1617_v23, %v4066_v16  ;;  %v4981_v45 = vld [vmem:[#allocation89_spill] sm:$0xff] }
 0x1ef   : > { %v1748_v34 = vrot.slane %v1741_v7, %v4022_v21  ;;  %v1813_v60 = vcombine.low %v4979_v31, %v4120_v25  ;;  %v1789_v61 = vcombine.low %v4980_v59, %v4122_v35  ;;  %v1828_v9 = vrot.slane %v1821_v54, %v4022_v21 }
 0x1f0   : > { %2532 = vrot.lane.b32.xlu1 %v1508_v13, %s3101_s5  ;;  %2530 = vrot.lane.b32.xlu0 %v1484_v51, %s3101_s5  ;;  %v4977_v51 = vld [vmem:[#allocation73_spill] sm:$0xff]  ;;  %v1804_v4 = vrot.slane %v1797_v3, %v4022_v21  ;;  %v1914_v44 = vcombine.low %v4176_v15, %v4248_v57  ;;  %v1672_v36 = vrot.slane %v1665_v41, %v4066_v16  ;;  %v4982_v15 = vld [vmem:[#allocation90_spill] sm:$0xff] }
 0x1f1   : > { %v1765_v46 = vcombine.low %v4977_v51, %v4102_v63  ;;  %v1689_v63 = vcombine.low %v1680_v14, %v1688_v62  ;;  %v1757_v20 = vcombine.low %v1748_v34, %v1756_v11  ;;  %v1820_v23 = vrot.slane %v1813_v60, %v4022_v21  ;;  %v4983_v3 = vld [vmem:[#allocation93_spill] sm:$0xff]  ;;  %v4984_v41 = vld [vmem:[#allocation94_spill] sm:$0xff] }
 0x1f2   : > { %v4392_v0 = vpop.permute.xlu1 %2128  ;;  %v4394_v13 = vpop.permute.xlu0 %2126  ;;  %v1796_v62 = vrot.slane %v1789_v61, %v4022_v21  ;;  %v1906_v51 = vcombine.low %v4981_v45, %v4210_v32  ;;  %v1882_v57 = vcombine.low %v4982_v15, %v4212_v8  ;;  %v1921_v7 = vrot.slane %v1914_v44, %v4022_v21  ;;  %v4985_v60 = vld [vmem:[#allocation105_spill] sm:$0xff] }
 0x1f3   : > { %v1772_v56 = vrot.slane %v1765_v46, %v4022_v21  ;;  %v1696_v35 = vrot.slane %v1689_v63, %v4066_v16  ;;  %v1764_v37 = vrot.slane %v1757_v20, %v4066_v16  ;;  %v1962_v18 = vcombine.low %v4192_v30, %v4264_v52 }
 0x1f4   : > { %2536 = vrot.lane.b32.xlu1 %v1556_v26, %s3101_s5  ;;  %2534 = vrot.lane.b32.xlu0 %v1532_v48, %s3101_s5  ;;  %v1890_v26 = vcombine.low %v4178_v28, %v4250_v2  ;;  %v1829_v28 = vcombine.low %v1820_v23, %v1828_v9  ;;  %v1805_v2 = vcombine.low %v1796_v62, %v1804_v4  ;;  %v4987_v62 = vld [vmem:[#allocation109_spill] sm:$0xff]  ;;  %s3009_s5 = scalar_lea.vmem %s3008_s4, 512 }
 0x1f5   : > { %v1781_v39 = vcombine.low %v1772_v56, %v1780_v5  ;;  %v1938_v32 = vcombine.low %v4194_v58, %v4266_v53  ;;  %v1913_v11 = vrot.slane %v1906_v51, %v4022_v21  ;;  %v1889_v54 = vrot.slane %v1882_v57, %v4022_v21 }
 0x1f6   : > { %v4408_v42 = vpop.permute.xlu1 %2132  ;;  %v4410_v49 = vpop.permute.xlu0 %2130  ;;  %v1897_v14 = vrot.slane %v1890_v26, %v4022_v21  ;;  %v1954_v63 = vcombine.low %v4983_v3, %v4230_v43  ;;  %v2054_v30 = vcombine.low %v4282_v12, %v4354_v10  ;;  %v2030_v58 = vcombine.low %v4284_v50, %v4356_v33  ;;  %v4986_v12 = vld [vmem:[#allocation106_spill] sm:$0xff] }
 0x1f7   : > { %v1788_v46 = vrot.slane %v1781_v39, %v4066_v16  ;;  %v1836_v52 = vrot.slane %v1829_v28, %v4066_v16  ;;  %v1812_v53 = vrot.slane %v1805_v2, %v4066_v16  ;;  %v1969_v43 = vrot.slane %v1962_v18, %v4022_v21 }
 0x1f8   : > { %2548 = vrot.lane.b32.xlu1 %v1648_v19, %s3102_s12  ;;  %2546 = vrot.lane.b32.xlu0 %v1624_v1, %s3102_s12  ;;  %v1930_v19 = vcombine.low %v4984_v41, %v4232_v6  ;;  %v1922_v1 = vcombine.low %v1913_v11, %v1921_v7  ;;  %v1898_v56 = vcombine.low %v1889_v54, %v1897_v14  ;;  %v4989_v14 = vld [vmem:[#allocation121_spill] sm:$0xff] }
 0x1f9   : > { %v1945_v34 = vrot.slane %v1938_v32, %v4022_v21  ;;  %v2046_v59 = vcombine.low %v4985_v60, %v4320_v40  ;;  %v2022_v10 = vcombine.low %v4986_v12, %v4322_v38  ;;  %v1961_v50 = vrot.slane %v1954_v63, %v4022_v21  ;;  %v4990_v32 = vld [vmem:[#allocation122_spill] sm:$0xff] }
 0x1fa   : > { %v4426_v48 = vpop.permute.xlu1 %2140  ;;  %v4428_v25 = vpop.permute.xlu0 %2138  ;;  %v1937_v33 = vrot.slane %v1930_v19, %v4022_v21  ;;  %v2061_v61 = vrot.slane %v2054_v30, %v4022_v21  ;;  %v2037_v39 = vrot.slane %v2030_v58, %v4022_v21  ;;  %v2102_v20 = vcombine.low %v4302_v47, %v4374_v27  ;;  %v4988_v47 = vld [vmem:[#allocation110_spill] sm:$0xff] }
 0x1fb   : > { %v2078_v9 = vcombine.low %v4304_v24, %v4376_v55  ;;  %v1970_v40 = vcombine.low %v1961_v50, %v1969_v43  ;;  %v1929_v26 = vrot.slane %v1922_v1, %v4066_v16  ;;  %v2029_v23 = vrot.slane %v2022_v10, %v4022_v21 }
 0x1fc   : > { %2552 = vrot.lane.b32.xlu1 %v1696_v35, %s3102_s12  ;;  %2550 = vrot.lane.b32.xlu0 %v1672_v36, %s3102_s12  ;;  %v1946_v4 = vcombine.low %v1937_v33, %v1945_v34  ;;  %v1905_v35 = vrot.slane %v1898_v56, %v4066_v16  ;;  %v2053_v36 = vrot.slane %v2046_v59, %v4022_v21  ;;  %v4992_v56 = vld [vmem:[#allocation126_spill] sm:$0xff] }
 0x1fd   : > { %v2094_v45 = vcombine.low %v4987_v62, %v4336_v29  ;;  %v2070_v27 = vcombine.low %v4988_v47, %v4338_v17  ;;  %v2038_v55 = vcombine.low %v2029_v23, %v2037_v39  ;;  %v2109_v51 = vrot.slane %v2102_v20, %v4022_v21  ;;  %v4997_v62 = vld [vmem:[#allocation25_spill] sm:$0xff] }
 0x1fe   : > { %v4446_v5 = vpop.permute.xlu1 %2144  ;;  %v4448_v8 = vpop.permute.xlu0 %2142  ;;  %v2062_v24 = vcombine.low %v2053_v36, %v2061_v61  ;;  %v2085_v15 = vrot.slane %v2078_v9, %v4022_v21  ;;  %v1977_v57 = vrot.slane %v1970_v40, %v4066_v16  ;;  %v1953_v28 = vrot.slane %v1946_v4, %v4066_v16  ;;  %v2971_v9 = vld [vmem:[%s3208_s23 + $0x4] sm:$0x1]  ;;  %v4996_v36 = vld [vmem:[#allocation17_spill] sm:$0xff] }
 0x1ff   : > { %v2077_v7 = vrot.slane %v2070_v27, %v4022_v21  ;;  %v2186_v18 = vcombine.low %v4989_v14, %v4426_v48  ;;  %v2162_v11 = vcombine.low %v4990_v32, %v4428_v25  ;;  %v2210_v43 = vcombine.low %v4992_v56, %v4448_v8  ;;  %v4993_v40 = vld [vmem:[#allocation20_spill] sm:$0xff] }
 0x200   : > { %2564 = vrot.lane.b32.xlu1 %v1788_v46, %s3103_s13  ;;  %2562 = vrot.lane.b32.xlu0 %v1764_v37, %s3103_s13  ;;  %v2101_v37 = vrot.slane %v2094_v45, %v4022_v21  ;;  %v223_v4 = vcombine.low %v2971_v9, %v4993_v40  ;;  %v4998_v45 = vld [vmem:[#allocation13_spill] sm:$0xff]  ;;  %v5005_v56 = vld [vmem:[#allocation12_spill] sm:$0xff] }
 0x201   : > { %v2086_v3 = vcombine.low %v2077_v7, %v2085_v15  ;;  %v2193_v25 = vrot.slane %v2186_v18, %v4022_v21  ;;  %v2217_v8 = vrot.slane %v2210_v43, %v4022_v21  ;;  %v207_v47 = vcombine.low %v4998_v45, %v4997_v62 }
 0x202   : > { %v2153_v6 = vpop.permute.xlu1 %2152  ;;  %v2151_v31 = vpop.permute.xlu0 %2150  ;;  %v2110_v54 = vcombine.low %v2101_v37, %v2109_v51  ;;  %v230_v32 = vrot.slane %v223_v4, %v4022_v21 }
 0x203   : > { %v2194_v2 = vcombine.low %v4392_v0, %v2153_v6  ;;  %v2170_v29 = vcombine.low %v4394_v13, %v2151_v31  ;;  %v2069_v0 = vrot.slane %v2062_v24, %v4066_v16  ;;  %v2045_v13 = vrot.slane %v2038_v55, %v4066_v16 }
 0x204   : > { %2568 = vrot.lane.b32.xlu1 %v1836_v52, %s3103_s13  ;;  %2566 = vrot.lane.b32.xlu0 %v1812_v53, %s3103_s13  ;;  %v2169_v52 = vrot.slane %v2162_v11, %v4022_v21  ;;  %v4991_v53 = vld [vmem:[#allocation125_spill] sm:$0xff]  ;;  %v2972_v11 = vld [vmem:[%s3208_s23] sm:$0x1] }
 0x205   : > { %v2201_v63 = vrot.slane %v2194_v2, %v4022_v21  ;;  %v2177_v41 = vrot.slane %v2170_v29, %v4022_v21  ;;  %v2234_v1 = vcombine.low %v4991_v53, %v4446_v5  ;;  %v5000_v2 = vld [vmem:[#allocation141_spill] sm:$0xff] }
 0x206   : > { %v2157_v44 = vpop.permute.xlu1 %2156  ;;  %v2155_v38 = vpop.permute.xlu0 %2154 }
 0x207   : > { %v2242_v19 = vcombine.low %v4408_v42, %v2157_v44  ;;  %v2218_v30 = vcombine.low %v4410_v49, %v2155_v38  ;;  %v2117_v42 = vrot.slane %v2110_v54, %v4066_v16  ;;  %v2093_v49 = vrot.slane %v2086_v3, %v4066_v16  ;;  %v4994_v38 = vld [vmem:[#allocation137_spill] sm:$0xff] }
 0x208   : > { %2580 = vrot.lane.b32.xlu1 %v1929_v26, %s3104_s15  ;;  %2578 = vrot.lane.b32.xlu0 %v1905_v35, %s3104_s15  ;;  %v2202_v34 = vcombine.low %v2193_v25, %v2201_v63  ;;  %v2178_v6 = vcombine.low %v2169_v52, %v2177_v41  ;;  %v2241_v5 = vrot.slane %v2234_v1, %v4022_v21  ;;  %v4995_v35 = vld [vmem:[#allocation24_spill] sm:$0xff]  ;;  %v5002_v25 = vld [vmem:[#allocation26_spill] sm:$0xff]  ;;  %v5004_v1 = vld [vmem:[#allocation27_spill] sm:$0xff] }
 0x209   : > { %v2249_v31 = vrot.slane %v2242_v19, %v4022_v21  ;;  %v2225_v60 = vrot.slane %v2218_v30, %v4022_v21  ;;  %v231_v23 = vcombine.low %v4996_v36, %v4995_v35  ;;  %v5003_v52 = vld [vmem:[#allocation16_spill] sm:$0xff]  ;;  %v255_v43 = vcombine.low %v5005_v56, %v5004_v1 }
 0x20a   : > { %v4490_v46 = vpop.permute.xlu1 %2268  ;;  %v4492_v17 = vpop.permute.xlu0 %2266  ;;  %v2209_v10 = vrot.slane %v2202_v34, %v4066_v16  ;;  %v2185_v50 = vrot.slane %v2178_v6, %v4066_v16  ;;  %v279_v53 = vcombine.low %v5003_v52, %v5002_v25 }
 0x20b   : > { %v2250_v33 = vcombine.low %v2241_v5, %v2249_v31  ;;  %v2226_v61 = vcombine.low %v2217_v8, %v2225_v60  ;;  %v2973_v60 = vld [vmem:[%s3208_s23 + $0xc] sm:$0x1]  ;;  %v2974_v5 = vld [vmem:[%s3208_s23 + $0x8] sm:$0x1]  ;;  %v5007_v8 = vld [vmem:[#allocation23_spill] sm:$0xff]  ;;  %v262_v4 = vrot.slane %v255_v43, %v4022_v21  ;;  %s2830_s23 = sshll.u32 %s3204_s16, 4 }
 0x20c   : > { %2584 = vrot.lane.b32.xlu1 %v1977_v57, %s3104_s15  ;;  %2582 = vrot.lane.b32.xlu0 %v1953_v28, %s3104_s15  ;;  %v286_v40 = vrot.slane %v279_v53, %v4022_v21  ;;  %s152_s18 = scalar_lea.vmem [#allocation5], %s2830_s23 }
 0x20d   : > { %v2257_v27 = vrot.slane %v2250_v33, %v4066_v16  ;;  %v2233_v24 = vrot.slane %v2226_v61, %v4066_v16  ;;  %s2734_s25 = sshll.u32 %s152_s18, 4  ;;  %s4619_s25 = int_to_ptr.vmem [resolvable:$true] %s2734_s25 }
 0x20e   : > { %v4506_v48 = vpop.permute.xlu1 %2272  ;;  %v4508_v58 = vpop.permute.xlu0 %2270  ;;  %s3003_s2 = scalar_lea.vmem %s4619_s25, 256  ;;  %p3010_p1 = scmp.lt.s32.totalorder %s4619_s25, %s3008_s4 }
 0x20f   : > { %p3004_p8 = scmp.ne.s32.totalorder %s4619_s25, %s3003_s2  ;;  %p3011_p3 = scmp.lt.s32.totalorder %s3009_s5, %s3003_s2 }
 0x210   : > { %2596 = vrot.lane.b32.xlu1 %v2069_v0, %s3105_s17  ;;  %2594 = vrot.lane.b32.xlu0 %v2045_v13, %s3105_s17  ;;  %v214_v13 = vrot.slane %v207_v47, %v4022_v21 }
 0x211   : > { %p3005_p12 = pnand %p3004_p8, %p3171_p9  ;;  %p3012_p5 = por %p3011_p3, %p3010_p1 }
 0x212   : > { %v2281_v59 = vpop.permute.xlu1 %2280  ;;  %v2279_v12 = vpop.permute.xlu0 %2278 }
 0x213   : > { %v2326_v44 = vcombine.low %v3979_v22, %v2281_v59  ;;  %v2302_v26 = vcombine.low %v4994_v38, %v2279_v12  ;;  %v4999_v22 = vld [vmem:[#allocation140_spill] sm:$0xff]  ;;  %v5006_v59 = vld [vmem:[#allocation22_spill] sm:$0xff]  ;;  %p3006_p0 = pneg %p3005_p12 }
 0x214   : > { %2600 = vrot.lane.b32.xlu1 %v2117_v42, %s3105_s17  ;;  %2598 = vrot.lane.b32.xlu0 %v2093_v49, %s3105_s17  ;;  %v271_v12 = vcombine.low %v2973_v60, %v5006_v59 }
 0x215   : > { %v2333_v37 = vrot.slane %v2326_v44, %v4022_v21  ;;  %v2309_v7 = vrot.slane %v2302_v26, %v4022_v21  ;;  %p3013_p6 = pnand %p3012_p5, %p3006_p0 }
 0x216   : > { %v2285_v39 = vpop.permute.xlu1 %2284  ;;  %v2283_v20 = vpop.permute.xlu0 %2282  ;;  %v278_v26 = vrot.slane %v271_v12, %v4022_v21 }
 0x217   : > { %v2374_v28 = vcombine.low %v4999_v22, %v2285_v39  ;;  %v2350_v29 = vcombine.low %v5000_v2, %v2283_v20 }
 0x218   : > { %2612 = vrot.lane.b32.xlu1 %v2209_v10, %s3106_s22  ;;  %2610 = vrot.lane.b32.xlu0 %v2185_v50, %s3106_s22  ;;  %v247_v10 = vcombine.low %v2974_v5, %v5007_v8  ;;  %v287_v45 = vcombine.low %v278_v26, %v286_v40 }
 0x219   : > { %v2381_v42 = vrot.slane %v2374_v28, %v4022_v21  ;;  %v2357_v49 = vrot.slane %v2350_v29, %v4022_v21 }
 0x21a   : > { %v2293_v55 = vpop.permute.xlu1 %2292  ;;  %v2291_v51 = vpop.permute.xlu0 %2290  ;;  %v254_v35 = vrot.slane %v247_v10, %v4022_v21  ;;  %v294_v22 = vrot.slane %v287_v45, %v4066_v16 }
 0x21b   : > { %v2334_v15 = vcombine.low %v4490_v46, %v2293_v55  ;;  %v2310_v57 = vcombine.low %v4492_v17, %v2291_v51  ;;  %v5001_v46 = vld [vmem:[#allocation21_spill] sm:$0xff]  ;;  %v238_v17 = vrot.slane %v231_v23, %v4022_v21 }
 0x21c   : > { %2616 = vrot.lane.b32.xlu1 %v2257_v27, %s3106_s22  ;;  %2614 = vrot.lane.b32.xlu0 %v2233_v24, %s3106_s22  ;;  %v199_v0 = vcombine.low %v2972_v11, %v5001_v46  ;;  %v263_v47 = vcombine.low %v254_v35, %v262_v4 }
 0x21d   : > { %v2341_v14 = vrot.slane %v2334_v15, %v4022_v21  ;;  %v2317_v18 = vrot.slane %v2310_v57, %v4022_v21  ;;  %v239_v61 = vcombine.low %v230_v32, %v238_v17 }
 0x21e   : > { %v2297_v54 = vpop.permute.xlu1 %2296  ;;  %v2295_v3 = vpop.permute.xlu0 %2294  ;;  %v270_v28 = vrot.slane %v263_v47, %v4066_v16 }
 0x21f   : > { %v2342_v63 = vcombine.low %v2333_v37, %v2341_v14  ;;  %v2318_v41 = vcombine.low %v2309_v7, %v2317_v18  ;;  %v2382_v19 = vcombine.low %v4506_v48, %v2297_v54  ;;  %v2358_v30 = vcombine.low %v4508_v58, %v2295_v3 }
 0x220   : > { %v206_v58 = vrot.slane %v199_v0, %v4022_v21  ;;  %v246_v62 = vrot.slane %v239_v61, %v4066_v16 }
 0x221   : > { %v2349_v34 = vrot.slane %v2342_v63, %v4066_v16  ;;  %v2325_v6 = vrot.slane %v2318_v41, %v4066_v16  ;;  %v2389_v31 = vrot.slane %v2382_v19, %v4022_v21  ;;  %v2365_v48 = vrot.slane %v2358_v30, %v4022_v21 }
 0x222   : > { %v2405_v50 = vpop.permute.xlu1 %2404  ;;  %v2403_v33 = vpop.permute.xlu0 %2402  ;;  %v215_v9 = vcombine.low %v206_v58, %v214_v13 }
 0x223   : > { %v2390_v39 = vcombine.low %v2381_v42, %v2389_v31  ;;  %v2366_v20 = vcombine.low %v2357_v49, %v2365_v48  ;;  %2628 = vrot.lane.b32.xlu1 %v2349_v34, %s3107_s24  ;;  %2626 = vrot.lane.b32.xlu0 %v2325_v6, %s3107_s24  ;;  %v2640_v24 = vsel %vm2638_vm0, %v246_v62, %v2405_v50 }
 0x224   : > { %v222_v27 = vrot.slane %v215_v9, %v4066_v16 }
 0x225   : > { %v2397_v44 = vrot.slane %v2390_v39, %v4066_v16  ;;  %v2373_v38 = vrot.slane %v2366_v20, %v4066_v16 }
 0x226   : > { %v2409_v36 = vpop.permute.xlu1 %2408  ;;  %v2407_v23 = vpop.permute.xlu0 %2406  ;;  %v2639_v55 = vsel %vm2638_vm0, %v222_v27, %v2403_v33 }
 0x227   : > { %2632 = vrot.lane.b32.xlu1 %v2397_v44, %s3107_s24  ;;  %2630 = vrot.lane.b32.xlu0 %v2373_v38, %s3107_s24  ;;  %v2642_v2 = vsel %vm2638_vm0, %v294_v22, %v2409_v36  ;;  %v2641_v29 = vsel %vm2638_vm0, %v270_v28, %v2407_v23 }
 0x22a   : > { %v2421_v51 = vpop.permute.xlu1 %2420  ;;  %v2419_v15 = vpop.permute.xlu0 %2418 }
 0x22b   : > { %v2645_v57 = vsel %vm2643_vm1, %v2640_v24, %v2421_v51  ;;  %v2644_v21 = vsel %vm2643_vm1, %v2639_v55, %v2419_v15 }
 0x22e   : > { %v2425_v37 = vpop.permute.xlu1 %2424  ;;  %v2423_v7 = vpop.permute.xlu0 %2422 }
 0x22f   : > { %v2647_v14 = vsel %vm2643_vm1, %v2642_v2, %v2425_v37  ;;  %v2646_v18 = vsel %vm2643_vm1, %v2641_v29, %v2423_v7 }
 0x232   : > { %v2437_v32 = vpop.permute.xlu1 %2436  ;;  %v2435_v11 = vpop.permute.xlu0 %2434 }
 0x233   : > { %v2650_v46 = vsel %vm2648_vm2, %v2645_v57, %v2437_v32  ;;  %v2649_v0 = vsel %vm2648_vm2, %v2644_v21, %v2435_v11 }
 0x236   : > { %v2441_v17 = vpop.permute.xlu1 %2440  ;;  %v2439_v13 = vpop.permute.xlu0 %2438 }
 0x237   : > { %v2652_v54 = vsel %vm2648_vm2, %v2647_v14, %v2441_v17  ;;  %v2651_v3 = vsel %vm2648_vm2, %v2646_v18, %v2439_v13 }
 0x23a   : > { %v2453_v63 = vpop.permute.xlu1 %2452  ;;  %v2451_v16 = vpop.permute.xlu0 %2450 }
 0x23b   : > { %v2655_v41 = vsel %vm2653_vm3, %v2650_v46, %v2453_v63  ;;  %v2654_v19 = vsel %vm2653_vm3, %v2649_v0, %v2451_v16 }
 0x23e   : > { %v2457_v30 = vpop.permute.xlu1 %2456  ;;  %v2455_v25 = vpop.permute.xlu0 %2454 }
 0x23f   : > { %v2657_v52 = vsel %vm2653_vm3, %v2652_v54, %v2457_v30  ;;  %v2656_v53 = vsel %vm2653_vm3, %v2651_v3, %v2455_v25 }
 0x242   : > { %v2469_v1 = vpop.permute.xlu1 %2468  ;;  %v2467_v56 = vpop.permute.xlu0 %2466 }
 0x243   : > { %v2660_v43 = vsel %vm2658_vm4, %v2655_v41, %v2469_v1  ;;  %v2659_v42 = vsel %vm2658_vm4, %v2654_v19, %v2467_v56 }
 0x246   : > { %v2473_v49 = vpop.permute.xlu1 %2472  ;;  %v2471_v34 = vpop.permute.xlu0 %2470 }
 0x247   : > { %v2662_v6 = vsel %vm2658_vm4, %v2657_v52, %v2473_v49  ;;  %v2661_v31 = vsel %vm2658_vm4, %v2656_v53, %v2471_v34 }
 0x24a   : > { %v2485_v48 = vpop.permute.xlu1 %2484  ;;  %v2483_v58 = vpop.permute.xlu0 %2482 }
 0x24b   : > { %v2665_v2 = vsel %vm2663_vm5, %v2660_v43, %v2485_v48  ;;  %v2664_v29 = vsel %vm2663_vm5, %v2659_v42, %v2483_v58 }
 0x24e   : > { %v2489_v60 = vpop.permute.xlu1 %2488  ;;  %v2487_v59 = vpop.permute.xlu0 %2486 }
 0x24f   : > { %v2667_v11 = vsel %vm2663_vm5, %v2662_v6, %v2489_v60  ;;  %v2666_v13 = vsel %vm2663_vm5, %v2661_v31, %v2487_v59 }
 0x252   : > { %v2501_v12 = vpop.permute.xlu1 %2500  ;;  %v2499_v5 = vpop.permute.xlu0 %2498 }
 0x253   : > { %v2670_v37 = vsel %vm2668_vm6, %v2665_v2, %v2501_v12  ;;  %v2669_v7 = vsel %vm2668_vm6, %v2664_v29, %v2499_v5 }
 0x256   : > { %v2505_v8 = vpop.permute.xlu1 %2504  ;;  %v2503_v10 = vpop.permute.xlu0 %2502 }
 0x257   : > { %v2672_v54 = vsel %vm2668_vm6, %v2667_v11, %v2505_v8  ;;  %v2671_v41 = vsel %vm2668_vm6, %v2666_v13, %v2503_v10 }
 0x25a   : > { %v2517_v50 = vpop.permute.xlu1 %2516  ;;  %v2515_v33 = vpop.permute.xlu0 %2514 }
 0x25b   : > { %v2675_v14 = vsel %vm2673_vm7, %v2670_v37, %v2517_v50  ;;  %v2674_v18 = vsel %vm2673_vm7, %v2669_v7, %v2515_v33 }
 0x25e   : > { %v2521_v61 = vpop.permute.xlu1 %2520  ;;  %v2519_v39 = vpop.permute.xlu0 %2518 }
 0x25f   : > { %v2677_v19 = vsel %vm2673_vm7, %v2672_v54, %v2521_v61  ;;  %v2676_v52 = vsel %vm2673_vm7, %v2671_v41, %v2519_v39 }
 0x262   : > { %v2533_v20 = vpop.permute.xlu1 %2532  ;;  %v2531_v9 = vpop.permute.xlu0 %2530 }
 0x263   : > { %v2680_v32 = vsel %vm2678_vm8, %v2675_v14, %v2533_v20  ;;  %v2679_v46 = vsel %vm2678_vm8, %v2674_v18, %v2531_v9 }
 0x266   : > { %v2537_v40 = vpop.permute.xlu1 %2536  ;;  %v2535_v4 = vpop.permute.xlu0 %2534 }
 0x267   : > { %v2682_v53 = vsel %vm2678_vm8, %v2677_v19, %v2537_v40  ;;  %v2681_v43 = vsel %vm2678_vm8, %v2676_v52, %v2535_v4 }
 0x26a   : > { %v2549_v44 = vpop.permute.xlu1 %2548  ;;  %v2547_v38 = vpop.permute.xlu0 %2546 }
 0x26b   : > { %v2685_v0 = vsel %vm2683_vm9, %v2680_v32, %v2549_v44  ;;  %v2684_v3 = vsel %vm2683_vm9, %v2679_v46, %v2547_v38 }
 0x26e   : > { %v2553_v26 = vpop.permute.xlu1 %2552  ;;  %v2551_v35 = vpop.permute.xlu0 %2550 }
 0x26f   : > { %v2687_v42 = vsel %vm2683_vm9, %v2682_v53, %v2553_v26  ;;  %v2686_v31 = vsel %vm2683_vm9, %v2681_v43, %v2551_v35 }
 0x272   : > { %v2565_v36 = vpop.permute.xlu1 %2564  ;;  %v2563_v23 = vpop.permute.xlu0 %2562 }
 0x273   : > { %v2690_v63 = vsel %vm2688_vm10, %v2685_v0, %v2565_v36  ;;  %v2689_v30 = vsel %vm2688_vm10, %v2684_v3, %v2563_v23 }
 0x276   : > { %v2569_v62 = vpop.permute.xlu1 %2568  ;;  %v2567_v45 = vpop.permute.xlu0 %2566 }
 0x277   : > { %v2692_v48 = vsel %vm2688_vm10, %v2687_v42, %v2569_v62  ;;  %v2691_v12 = vsel %vm2688_vm10, %v2686_v31, %v2567_v45 }
 0x27a   : > { %v2581_v47 = vpop.permute.xlu1 %2580  ;;  %v2579_v27 = vpop.permute.xlu0 %2578 }
 0x27b   : > { %v2695_v25 = vsel %vm2693_vm11, %v2690_v63, %v2581_v47  ;;  %v2694_v1 = vsel %vm2693_vm11, %v2689_v30, %v2579_v27 }
 0x27e   : > { %v2585_v24 = vpop.permute.xlu1 %2584  ;;  %v2583_v55 = vpop.permute.xlu0 %2582 }
 0x27f   : > { %v2697_v5 = vsel %vm2693_vm11, %v2692_v48, %v2585_v24  ;;  %v2696_v10 = vsel %vm2693_vm11, %v2691_v12, %v2583_v55 }
 0x282   : > { %v2597_v51 = vpop.permute.xlu1 %2596  ;;  %v2595_v15 = vpop.permute.xlu0 %2594 }
 0x283   : > { %v2700_v56 = vsel %vm2698_vm12, %v2695_v25, %v2597_v51  ;;  %v2699_v49 = vsel %vm2698_vm12, %v2694_v1, %v2595_v15 }
 0x286   : > { %v2601_v57 = vpop.permute.xlu1 %2600  ;;  %v2599_v21 = vpop.permute.xlu0 %2598 }
 0x287   : > { %v2702_v50 = vsel %vm2698_vm12, %v2697_v5, %v2601_v57  ;;  %v2701_v33 = vsel %vm2698_vm12, %v2696_v10, %v2599_v21 }
 0x28a   : > { %v2613_v22 = vpop.permute.xlu1 %2612  ;;  %v2611_v28 = vpop.permute.xlu0 %2610 }
 0x28b   : > { %v2705_v34 = vsel %vm2703_vm13, %v2700_v56, %v2613_v22  ;;  %v2704_v58 = vsel %vm2703_vm13, %v2699_v49, %v2611_v28 }
 0x28e   : > { %v2617_v17 = vpop.permute.xlu1 %2616  ;;  %v2615_v16 = vpop.permute.xlu0 %2614 }
 0x28f   : > { %v2707_v61 = vsel %vm2703_vm13, %v2702_v50, %v2617_v17  ;;  %v2706_v20 = vsel %vm2703_vm13, %v2701_v33, %v2615_v16 }
 0x295   : > { %v2629_v6 = vpop.permute.xlu1 %2628  ;;  %v2627_v59 = vpop.permute.xlu0 %2626 }
 0x296   : > { %v2710_v60 = vsel %vm2708_vm14, %v2705_v34, %v2629_v6  ;;  %v2709_v8 = vsel %vm2708_vm14, %v2704_v58, %v2627_v59 }
 0x297   : > { %2715 = vst.msk [vmem:[%s152_s18 + $0x4] sm:$0xf] %vm2713_vm15, %v2710_v60  ;;  %2714 = vst.msk [vmem:[%s152_s18] sm:$0xf] %vm2713_vm15, %v2709_v8 }
 0x299   : > { %v2633_v39 = vpop.permute.xlu1 %2632  ;;  %v2631_v40 = vpop.permute.xlu0 %2630 }
 0x29a   : > { %v2712_v9 = vsel %vm2708_vm14, %v2707_v61, %v2633_v39  ;;  %v2711_v4 = vsel %vm2708_vm14, %v2706_v20, %v2631_v40 }
 0x29b   : > { %2717 = vst.msk [vmem:[%s152_s18 + $0xc] sm:$0xf] %vm2713_vm15, %v2712_v9  ;;  %2716 = vst.msk [vmem:[%s152_s18 + $0x8] sm:$0xf] %vm2713_vm15, %v2711_v4 }
 0x29c   : > { %3016 = shalt.err (!%p3013_p6)
}
 0x29d   : > { %s3017_s12 = scalar_lea.hbm %s4626_s29, 256  ;;  %s3021_s17 = scalar_lea.hbm %s4679_s1, 512 }
 0x29e   : > { %p3018_p7 = scmp.ne.s32.totalorder %s4626_s29, %s3017_s12  ;;  %p3022_p13 = scmp.lt.s32.totalorder %s4626_s29, %s4679_s1 }
 0x29f   : > { %p3023_p2 = scmp.lt.s32.totalorder %s3021_s17, %s3017_s12 }
 0x2a0   : > { %p3019_p10 = pnand %p3018_p7, %p3171_p9 }
 0x2a1   : > { %p3024_p8 = por %p3023_p2, %p3022_p13 }
 0x2a2   : > { %p3020_p4 = pneg %p3019_p10 }
 0x2a4   : > { %p3025_p12 = pnand %p3024_p8, %p3020_p4 }
 0x2a6   : > { %3028 = shalt.err (!%p3025_p12)
}
 0x2a7   : > { %s3109_s23 = smov 64  }
 0x2a8   : > { %2888 = dma.vmem_to_hbm [thread:$0]  (%p3171_p9), %s4619_s25, 256, %s4626_s29, %s2719_s30, %s3109_s23, %s3109_s23, %s3093_s26  }
 0x2a9 PF: > { %s2749_s18 = sand.u32 1, %s3063_s6   ;;  %p5008_p0 = scmp.ge.s32.totalorder %s3083_s11, 2 }
 0x2aa   : > { %s2750_s27 = scalar_lea.sflag [#allocation4], %s2749_s18 }
 0x2ab   : > { %p2895_p1 = pnand %p5008_p0, %p3178_p11 }
 0x2ad   : > { %p2896_p3 = pneg %p2895_p1 }
 0x2af   : > { %3058 = dma.done.wait (%p2896_p3), %s2750_s27, 256  }
 0x2b0   : > { %3060 = vsyncadd (%p2896_p3), %s2750_s27, 4294967040  ;;  %s17_s11 = sadd.s32 1, %s3083_s11   ;;  %s5009_s6 = smov %s3067_s7 }
 0x2b1   : > { %p14_p5 = scmp.ge.s32.totalorder %s17_s11, 4   ;;  %s5010_s7 = smov %s3071_s8 }
 0x2b2   : > { %s5011_s8 = smov %s3176_s20  ;;  %s5012_s9 = smov %s3079_s10 }
 0x2b3   : > { %s5013_s10 = smov %s5015_s14  ;;  %16 = sbr.rel (!%p14_p5) target bundleno = 6 (0x6), region = 72 }
 0x2b8   :  { %2755 = vsyncpa [#allocation3], 1 }
 0x2b9   :  { %2757 = vsyncpa [#allocation3 + $0x1], 1 }
 0x2ba   :  { %2758 = vsyncpa [#allocation4], 1 }
 0x2bb   :  { %2760 = vsyncpa [#allocation4 + $0x1], 1 }

</bundles_post_ra>
